<compile_context>
chip_gen: v7x
topology: tpu7x:2x2x1
jax: 0.10.0
libtpu: 0.0.40
codegen_flags: <defaults>
</compile_context>

<pallas_src>
import functools

import numpy as np

import jax
import jax.numpy as jnp
from jax.experimental import pallas as pl
from jax.experimental.pallas import tpu as pltpu


# ------------------------------ fused kernel -------------------------------

def _net_kernel(x_ref, b1_ref, r1_ref, l1_ref, b2_ref, r2_ref, l2_ref,
                wf1_ref, wf2_ref, cb1_ref, cb2_ref, fb1_ref, fb2_ref,
                out_ref, *, tb):
    f32 = jnp.float32
    bf16 = jnp.bfloat16

    def gather_rows(src, img_rows, start, nrows):
        # rows (start .. start+nrows-1) of every image in the tile, image-major.
        parts = [src[b * img_rows + start:b * img_rows + start + nrows, :]
                 for b in range(tb)]
        return parts[0] if tb == 1 else jnp.concatenate(parts, axis=0)

    def pool2x2_relu(y, r_ref, l_ref):
        # 2x2 max-pool + ReLU via exact 0/1 selection matmuls (MXU) + max (VPU).
        cols = jnp.maximum(jnp.dot(y, r_ref[0], preferred_element_type=f32),
                           jnp.dot(y, r_ref[1], preferred_element_type=f32))
        rows = jnp.maximum(jnp.dot(l_ref[0], cols, preferred_element_type=f32),
                           jnp.dot(l_ref[1], cols, preferred_element_type=f32))
        return jnp.maximum(rows, 0.0)

    x = x_ref[...]                                        # (tb*28, 28) f32

    # conv1: 5 banded bf16 matmuls, output cols = (w_out, c_out) -> (tb*24, 240)
    y1 = cb1_ref[...] + jnp.zeros((tb * 24, 240), f32)    # bias, f32 accumulator
    for ki in range(5):
        slab = gather_rows(x, 28, ki, 24).astype(bf16)    # (tb*24, 28)
        y1 = y1 + jnp.dot(slab, b1_ref[ki], preferred_element_type=f32)
    p1 = pool2x2_relu(y1, r1_ref, l1_ref)                 # (tb*12, 120)

    # conv2
    # TODO(synk): Dropout2d(p=0.5) and F.dropout are identities in inference mode.
    y2 = cb2_ref[...] + jnp.zeros((tb * 8, 160), f32)
    for ki in range(5):
        slab = gather_rows(p1, 12, ki, 8).astype(bf16)    # (tb*8, 120)
        y2 = y2 + jnp.dot(slab, b2_ref[ki], preferred_element_type=f32)
    p2 = pool2x2_relu(y2, r2_ref, l2_ref)                 # (tb*4, 80), rows (h, image)

    # fc1 + relu: PyTorch's NCHW view(-1, 320) is folded into wf1's layout.
    h = fb1_ref[...] + jnp.zeros((tb, 50), f32)
    for row in range(4):
        blk = p2[row * tb:(row + 1) * tb, :].astype(bf16)  # (tb, 80)
        h = h + jnp.dot(blk, wf1_ref[row], preferred_element_type=f32)
    h = jnp.maximum(h, 0.0)

    # fc2
    out = jnp.dot(h.astype(bf16), wf2_ref[...], preferred_element_type=f32)
    out_ref[...] = (out + fb2_ref[...]).astype(out_ref.dtype)


# --------------------------- one-time weight prep ---------------------------

def prepare_params(params, batch_tile):
    """Repack PyTorch-layout weights into the matrices the fused kernel uses.

    Done once at init (hoisted out of the forward pass):
      * B1/B2   : banded conv matrices, columns ordered (out_col, out_channel),
      * R*/L*   : exact 0/1 selection matrices for the 2x2 max-pool gather,
      * Wfc1    : fc1 weights re-ordered so the NCHW view(-1, 320) flatten
                  needs no runtime transpose,
      * conv/fc weights cast to bf16 (native MXU input); selection matrices
        and biases stay f32.
    """
    tb = batch_tile
    f32 = np.float32
    hi = jax.lax.Precision.HIGHEST

    w1 = params["conv1_w"].astype(jnp.float32)            # (10, 1, 5, 5)
    w2 = params["conv2_w"].astype(jnp.float32)            # (20, 10, 5, 5)

    # indicator[in_col, out_col, kj] = 1  iff  in_col == out_col + kj
    def band_indicator(n_in, n_out, k):
        ind = np.zeros((n_in, n_out, k), f32)
        for kj in range(k):
            ind[np.arange(n_out) + kj, np.arange(n_out), kj] = 1.0
        return ind

    i1 = band_indicator(28, 24, 5)
    i2 = band_indicator(12, 8, 5)

    # B1[ki, w_in, w_out*10 + c_out]        = conv1_w[c_out, 0, ki, w_in - w_out]
    b1s = jnp.einsum("cab,ivb->aivc", w1[:, 0], i1, precision=hi).reshape(5, 28, 240)
    # B2[ki, w_in*10 + c_in, w_out*20 + c_out] = conv2_w[c_out, c_in, ki, w_in - w_out]
    b2s = jnp.einsum("ocab,ivb->aicvo", w2, i2, precision=hi).reshape(5, 120, 160)

    # column (width) selection for 2x2 pooling: kron(stride-2 selector, eye(C))
    def col_select(n_in, n_out, n_chan):
        sel = np.zeros((2, n_in * n_chan, n_out * n_chan), f32)
        for dw in range(2):
            s = np.zeros((n_in, n_out), f32)
            s[2 * np.arange(n_out) + dw, np.arange(n_out)] = 1.0
            sel[dw] = np.kron(s, np.eye(n_chan, dtype=f32))
        return jnp.asarray(sel)

    r1 = col_select(24, 12, 10)                            # (2, 240, 120)
    r2 = col_select(8, 4, 20)                              # (2, 160, 80)

    # row (height) selection; pool1 keeps (image, row) ordering ...
    l1 = np.zeros((2, tb * 12, tb * 24), f32)
    for dh in range(2):
        for b in range(tb):
            for i in range(12):
                l1[dh, b * 12 + i, b * 24 + 2 * i + dh] = 1.0
    # ... pool2 emits rows in (row, image) order so fc1 can slice contiguous
    # per-row blocks (the PyTorch flatten lives entirely in Wfc1's layout).
    l2 = np.zeros((2, tb * 4, tb * 8), f32)
    for dh in range(2):
        for i in range(4):
            for b in range(tb):
                l2[dh, i * tb + b, b * 8 + 2 * i + dh] = 1.0

    # fc1: feature f = c*16 + h*4 + w (NCHW flatten)  ->  Wfc1[h, w*20 + c, n]
    wf1 = params["fc1_w"].reshape(50, 20, 4, 4)            # (n, c, h, w)
    wf1 = jnp.transpose(wf1, (2, 3, 1, 0)).reshape(4, 80, 50)

    bf16 = jnp.bfloat16
    return {
        "B1": b1s.astype(bf16),
        "B2": b2s.astype(bf16),
        "R1": r1,
        "R2": r2,
        "L1": jnp.asarray(l1),
        "L2": jnp.asarray(l2),
        "Wfc1": wf1.astype(bf16),
        "Wfc2": params["fc2_w"].T.astype(bf16),            # (50, 10)
        "bias1": jnp.tile(params["conv1_b"], 24).reshape(1, 240),
        "bias2": jnp.tile(params["conv2_b"], 8).reshape(1, 160),
        "bfc1": params["fc1_b"].reshape(1, 50),
        "bfc2": params["fc2_b"].reshape(1, 10),
    }


# ------------------------------ forward wrapper -----------------------------

@jax.jit
def net_forward(prep, x):
    """x: (B, 1, 28, 28) NCHW float32 -> (B, 10) float32."""
    batch = x.shape[0]
    tb = prep["L1"].shape[1] // 12                         # batch tile baked into prep
    assert batch % tb == 0, "batch must be a multiple of the batch tile"
    x2d = x.reshape(batch * 28, 28)                        # (image*row, col), free reshape

    kernel = functools.partial(_net_kernel, tb=tb)
    return pl.pallas_call(
        kernel,
        out_shape=jax.ShapeDtypeStruct((batch, 10), jnp.float32),
        grid=(batch // tb,),
        in_specs=[
            pl.BlockSpec((tb * 28, 28), lambda i: (i, 0)),             # image tile
            pl.BlockSpec((5, 28, 240), lambda i: (0, 0, 0)),           # conv1 bands
            pl.BlockSpec((2, 240, 120), lambda i: (0, 0, 0)),          # pool1 col sel
            pl.BlockSpec((2, tb * 12, tb * 24), lambda i: (0, 0, 0)),  # pool1 row sel
            pl.BlockSpec((5, 120, 160), lambda i: (0, 0, 0)),          # conv2 bands
            pl.BlockSpec((2, 160, 80), lambda i: (0, 0, 0)),           # pool2 col sel
            pl.BlockSpec((2, tb * 4, tb * 8), lambda i: (0, 0, 0)),    # pool2 row sel
            pl.BlockSpec((4, 80, 50), lambda i: (0, 0, 0)),            # fc1 (reordered)
            pl.BlockSpec((50, 10), lambda i: (0, 0)),                  # fc2
            pl.BlockSpec((1, 240), lambda i: (0, 0)),                  # conv1 bias
            pl.BlockSpec((1, 160), lambda i: (0, 0)),                  # conv2 bias
            pl.BlockSpec((1, 50), lambda i: (0, 0)),                   # fc1 bias
            pl.BlockSpec((1, 10), lambda i: (0, 0)),                   # fc2 bias
        ],
        out_specs=pl.BlockSpec((tb, 10), lambda i: (i, 0)),
        compiler_params=pltpu.CompilerParams(
            dimension_semantics=("parallel",),   # shard batch tiles across TCs (v7x)
            vmem_limit_bytes=32 * 1024 * 1024,
        ),
    )(x2d, prep["B1"], prep["R1"], prep["L1"], prep["B2"], prep["R2"],
      prep["L2"], prep["Wfc1"], prep["Wfc2"], prep["bias1"], prep["bias2"],
      prep["bfc1"], prep["bfc2"])


# --------------------------- reference + init utils -------------------------

def reference_forward(params, x):
    """Pure-JAX/XLA reference (only used to validate the Pallas kernel)."""
    hi = jax.lax.Precision.HIGHEST

    def conv(v, w, b):
        y = jax.lax.conv_general_dilated(
            v, w, (1, 1), "VALID",
            dimension_numbers=("NCHW", "OIHW", "NCHW"), precision=hi)
        return y + b.reshape(1, -1, 1, 1)

    def pool_relu(v):
        n, c, hh, ww = v.shape
        v = v.reshape(n, c, hh // 2, 2, ww // 2, 2).max(axis=(3, 5))
        return jnp.maximum(v, 0.0)

    y = pool_relu(conv(x, params["conv1_w"], params["conv1_b"]))
    y = pool_relu(conv(y, params["conv2_w"], params["conv2_b"]))
    y = y.reshape(y.shape[0], 320)                        # == torch x.view(-1, 320)
    y = jnp.maximum(jnp.dot(y, params["fc1_w"].T, precision=hi) + params["fc1_b"], 0.0)
    return jnp.dot(y, params["fc2_w"].T, precision=hi) + params["fc2_b"]


def init_params(key):
    """Deterministic PyTorch-style (kaiming-uniform-ish) init; shapes from Net.__init__."""
    def u(k, shape, fan_in):
        bound = 1.0 / jnp.sqrt(jnp.float32(fan_in))
        return jax.random.uniform(k, shape, jnp.float32, -bound, bound)

    ks = jax.random.split(key, 8)
    return {
        "conv1_w": u(ks[0], (10, 1, 5, 5), 1 * 5 * 5),
        "conv1_b": u(ks[1], (10,), 1 * 5 * 5),
        "conv2_w": u(ks[2], (20, 10, 5, 5), 10 * 5 * 5),
        "conv2_b": u(ks[3], (20,), 10 * 5 * 5),
        "fc1_w": u(ks[4], (50, 320), 320),   # PyTorch Linear: (out, in)
        "fc1_b": u(ks[5], (50,), 320),
        "fc2_w": u(ks[6], (10, 50), 50),
        "fc2_b": u(ks[7], (10,), 50),
    }


if __name__ == "__main__":
    root = jax.random.PRNGKey(0)
    k_params, k_x = jax.random.split(root)

    params = init_params(k_params)
    # MNIST-shaped input (the 320-dim flatten fixes spatial size at 28x28); batch=2.
    x = jax.random.normal(k_x, (2, 1, 28, 28), dtype=jnp.float32)

    prep = prepare_params(params, batch_tile=2)   # one-time weight packing

    out = net_forward(prep, x)
    out = jax.block_until_ready(out)
    assert out.shape == (2, 10) and out.dtype == jnp.float32

    ref = reference_forward(params, x)
    err = float(jnp.max(jnp.abs(out - ref)))
    # bf16 matmul inputs with f32 accumulation: expected error ~1e-3, tol 3e-2.
    assert err < 3e-2, f"kernel/reference mismatch: max abs err = {err}"

    print("KERNEL_OK")
</pallas_src>

<mosaic_0001>
module attributes {stable_mosaic.version = 11 : i64} {
  func.func @_net_kernel(%arg0: i32, %arg1: memref<56x28xf32, #tpu.memory_space<vmem>>, %arg2: memref<5x28x240xbf16, #tpu.memory_space<vmem>>, %arg3: memref<2x240x120xf32, #tpu.memory_space<vmem>>, %arg4: memref<2x24x48xf32, #tpu.memory_space<vmem>>, %arg5: memref<5x120x160xbf16, #tpu.memory_space<vmem>>, %arg6: memref<2x160x80xf32, #tpu.memory_space<vmem>>, %arg7: memref<2x8x16xf32, #tpu.memory_space<vmem>>, %arg8: memref<4x80x50xbf16, #tpu.memory_space<vmem>>, %arg9: memref<50x10xbf16, #tpu.memory_space<vmem>>, %arg10: memref<1x240xf32, #tpu.memory_space<vmem>>, %arg11: memref<1x160xf32, #tpu.memory_space<vmem>>, %arg12: memref<1x50xf32, #tpu.memory_space<vmem>>, %arg13: memref<1x10xf32, #tpu.memory_space<vmem>>, %arg14: memref<2x10xf32, #tpu.memory_space<vmem>>) attributes {dimension_semantics = [#tpu.dimension_semantics<parallel>], iteration_bounds = array<i64: 1>, scalar_prefetch = 0 : i64, scratch_operands = 0 : i64, tpu.core_type = #tpu.core_type<tc>, window_params = [{transform_indices = @transform_0, window_bounds = array<i64: 56, 28>}, {pipeline_mode = #tpu.pipeline_mode<synchronous>, transform_indices = @transform_1, window_bounds = array<i64: 5, 28, 240>}, {pipeline_mode = #tpu.pipeline_mode<synchronous>, transform_indices = @transform_2, window_bounds = array<i64: 2, 240, 120>}, {pipeline_mode = #tpu.pipeline_mode<synchronous>, transform_indices = @transform_3, window_bounds = array<i64: 2, 24, 48>}, {pipeline_mode = #tpu.pipeline_mode<synchronous>, transform_indices = @transform_4, window_bounds = array<i64: 5, 120, 160>}, {pipeline_mode = #tpu.pipeline_mode<synchronous>, transform_indices = @transform_5, window_bounds = array<i64: 2, 160, 80>}, {pipeline_mode = #tpu.pipeline_mode<synchronous>, transform_indices = @transform_6, window_bounds = array<i64: 2, 8, 16>}, {pipeline_mode = #tpu.pipeline_mode<synchronous>, transform_indices = @transform_7, window_bounds = array<i64: 4, 80, 50>}, {pipeline_mode = #tpu.pipeline_mode<synchronous>, transform_indices = @transform_8, window_bounds = array<i64: 50, 10>}, {pipeline_mode = #tpu.pipeline_mode<synchronous>, transform_indices = @transform_9, window_bounds = array<i64: 1, 240>}, {pipeline_mode = #tpu.pipeline_mode<synchronous>, transform_indices = @transform_10, window_bounds = array<i64: 1, 160>}, {pipeline_mode = #tpu.pipeline_mode<synchronous>, transform_indices = @transform_11, window_bounds = array<i64: 1, 50>}, {pipeline_mode = #tpu.pipeline_mode<synchronous>, transform_indices = @transform_12, window_bounds = array<i64: 1, 10>}, {transform_indices = @transform_13, window_bounds = array<i64: 2, 10>}]} {
    %c0 = arith.constant 0 : index
    %c0_0 = arith.constant 0 : index
    %0 = vector.load %arg1[%c0, %c0_0] : memref<56x28xf32, #tpu.memory_space<vmem>>, vector<56x28xf32>
    %c0_1 = arith.constant 0 : index
    %c0_2 = arith.constant 0 : index
    %1 = vector.load %arg10[%c0_1, %c0_2] : memref<1x240xf32, #tpu.memory_space<vmem>>, vector<1x240xf32>
    %cst = arith.constant 0.000000e+00 : f32
    %2 = vector.broadcast %cst : f32 to vector<48x240xf32>
    %3 = vector.broadcast %1 : vector<1x240xf32> to vector<48x240xf32>
    %4 = arith.addf %3, %2 : vector<48x240xf32>
    %5 = vector.extract_strided_slice %0 {offsets = [0, 0], sizes = [24, 28], strides = [1, 1]} : vector<56x28xf32> to vector<24x28xf32>
    %6 = vector.extract_strided_slice %0 {offsets = [28, 0], sizes = [24, 28], strides = [1, 1]} : vector<56x28xf32> to vector<24x28xf32>
    %7 = tpu.concatenate %5, %6 in 0 : vector<24x28xf32>, vector<24x28xf32> -> vector<48x28xf32>
    %8 = arith.truncf %7 : vector<48x28xf32> to vector<48x28xbf16>
    %c0_3 = arith.constant 0 : index
    %c0_4 = arith.constant 0 : index
    %c0_5 = arith.constant 0 : index
    %9 = vector.load %arg2[%c0_3, %c0_4, %c0_5] : memref<5x28x240xbf16, #tpu.memory_space<vmem>>, vector<1x28x240xbf16>
    %10 = vector.shape_cast %9 : vector<1x28x240xbf16> to vector<28x240xbf16>
    %cst_6 = arith.constant dense<0.000000e+00> : vector<48x240xf32>
    %11 = tpu.matmul %8, %10, %cst_6 {dimension_numbers = #tpu.dot_dimension_numbers<[1], [0], [0], [1], [0, 0, 1, 1], [], []>} : vector<48x28xbf16>, vector<28x240xbf16>, vector<48x240xf32> -> vector<48x240xf32>
    %12 = arith.addf %4, %11 : vector<48x240xf32>
    %13 = vector.extract_strided_slice %0 {offsets = [1, 0], sizes = [24, 28], strides = [1, 1]} : vector<56x28xf32> to vector<24x28xf32>
    %14 = vector.extract_strided_slice %0 {offsets = [29, 0], sizes = [24, 28], strides = [1, 1]} : vector<56x28xf32> to vector<24x28xf32>
    %15 = tpu.concatenate %13, %14 in 0 : vector<24x28xf32>, vector<24x28xf32> -> vector<48x28xf32>
    %16 = arith.truncf %15 : vector<48x28xf32> to vector<48x28xbf16>
    %c1 = arith.constant 1 : index
    %c0_7 = arith.constant 0 : index
    %c0_8 = arith.constant 0 : index
    %17 = vector.load %arg2[%c1, %c0_7, %c0_8] : memref<5x28x240xbf16, #tpu.memory_space<vmem>>, vector<1x28x240xbf16>
    %18 = vector.shape_cast %17 : vector<1x28x240xbf16> to vector<28x240xbf16>
    %cst_9 = arith.constant dense<0.000000e+00> : vector<48x240xf32>
    %19 = tpu.matmul %16, %18, %cst_9 {dimension_numbers = #tpu.dot_dimension_numbers<[1], [0], [0], [1], [0, 0, 1, 1], [], []>} : vector<48x28xbf16>, vector<28x240xbf16>, vector<48x240xf32> -> vector<48x240xf32>
    %20 = arith.addf %12, %19 : vector<48x240xf32>
    %21 = vector.extract_strided_slice %0 {offsets = [2, 0], sizes = [24, 28], strides = [1, 1]} : vector<56x28xf32> to vector<24x28xf32>
    %22 = vector.extract_strided_slice %0 {offsets = [30, 0], sizes = [24, 28], strides = [1, 1]} : vector<56x28xf32> to vector<24x28xf32>
    %23 = tpu.concatenate %21, %22 in 0 : vector<24x28xf32>, vector<24x28xf32> -> vector<48x28xf32>
    %24 = arith.truncf %23 : vector<48x28xf32> to vector<48x28xbf16>
    %c2 = arith.constant 2 : index
    %c0_10 = arith.constant 0 : index
    %c0_11 = arith.constant 0 : index
    %25 = vector.load %arg2[%c2, %c0_10, %c0_11] : memref<5x28x240xbf16, #tpu.memory_space<vmem>>, vector<1x28x240xbf16>
    %26 = vector.shape_cast %25 : vector<1x28x240xbf16> to vector<28x240xbf16>
    %cst_12 = arith.constant dense<0.000000e+00> : vector<48x240xf32>
    %27 = tpu.matmul %24, %26, %cst_12 {dimension_numbers = #tpu.dot_dimension_numbers<[1], [0], [0], [1], [0, 0, 1, 1], [], []>} : vector<48x28xbf16>, vector<28x240xbf16>, vector<48x240xf32> -> vector<48x240xf32>
    %28 = arith.addf %20, %27 : vector<48x240xf32>
    %29 = vector.extract_strided_slice %0 {offsets = [3, 0], sizes = [24, 28], strides = [1, 1]} : vector<56x28xf32> to vector<24x28xf32>
    %30 = vector.extract_strided_slice %0 {offsets = [31, 0], sizes = [24, 28], strides = [1, 1]} : vector<56x28xf32> to vector<24x28xf32>
    %31 = tpu.concatenate %29, %30 in 0 : vector<24x28xf32>, vector<24x28xf32> -> vector<48x28xf32>
    %32 = arith.truncf %31 : vector<48x28xf32> to vector<48x28xbf16>
    %c3 = arith.constant 3 : index
    %c0_13 = arith.constant 0 : index
    %c0_14 = arith.constant 0 : index
    %33 = vector.load %arg2[%c3, %c0_13, %c0_14] : memref<5x28x240xbf16, #tpu.memory_space<vmem>>, vector<1x28x240xbf16>
    %34 = vector.shape_cast %33 : vector<1x28x240xbf16> to vector<28x240xbf16>
    %cst_15 = arith.constant dense<0.000000e+00> : vector<48x240xf32>
    %35 = tpu.matmul %32, %34, %cst_15 {dimension_numbers = #tpu.dot_dimension_numbers<[1], [0], [0], [1], [0, 0, 1, 1], [], []>} : vector<48x28xbf16>, vector<28x240xbf16>, vector<48x240xf32> -> vector<48x240xf32>
    %36 = arith.addf %28, %35 : vector<48x240xf32>
    %37 = vector.extract_strided_slice %0 {offsets = [4, 0], sizes = [24, 28], strides = [1, 1]} : vector<56x28xf32> to vector<24x28xf32>
    %38 = vector.extract_strided_slice %0 {offsets = [32, 0], sizes = [24, 28], strides = [1, 1]} : vector<56x28xf32> to vector<24x28xf32>
    %39 = tpu.concatenate %37, %38 in 0 : vector<24x28xf32>, vector<24x28xf32> -> vector<48x28xf32>
    %40 = arith.truncf %39 : vector<48x28xf32> to vector<48x28xbf16>
    %c4 = arith.constant 4 : index
    %c0_16 = arith.constant 0 : index
    %c0_17 = arith.constant 0 : index
    %41 = vector.load %arg2[%c4, %c0_16, %c0_17] : memref<5x28x240xbf16, #tpu.memory_space<vmem>>, vector<1x28x240xbf16>
    %42 = vector.shape_cast %41 : vector<1x28x240xbf16> to vector<28x240xbf16>
    %cst_18 = arith.constant dense<0.000000e+00> : vector<48x240xf32>
    %43 = tpu.matmul %40, %42, %cst_18 {dimension_numbers = #tpu.dot_dimension_numbers<[1], [0], [0], [1], [0, 0, 1, 1], [], []>} : vector<48x28xbf16>, vector<28x240xbf16>, vector<48x240xf32> -> vector<48x240xf32>
    %44 = arith.addf %36, %43 : vector<48x240xf32>
    %c0_19 = arith.constant 0 : index
    %c0_20 = arith.constant 0 : index
    %c0_21 = arith.constant 0 : index
    %45 = vector.load %arg3[%c0_19, %c0_20, %c0_21] : memref<2x240x120xf32, #tpu.memory_space<vmem>>, vector<1x240x120xf32>
    %46 = vector.shape_cast %45 : vector<1x240x120xf32> to vector<240x120xf32>
    %cst_22 = arith.constant dense<0.000000e+00> : vector<48x120xf32>
    %47 = tpu.matmul %44, %46, %cst_22 {dimension_numbers = #tpu.dot_dimension_numbers<[1], [0], [0], [1], [0, 0, 1, 1], [], []>} : vector<48x240xf32>, vector<240x120xf32>, vector<48x120xf32> -> vector<48x120xf32>
    %c1_23 = arith.constant 1 : index
    %c0_24 = arith.constant 0 : index
    %c0_25 = arith.constant 0 : index
    %48 = vector.load %arg3[%c1_23, %c0_24, %c0_25] : memref<2x240x120xf32, #tpu.memory_space<vmem>>, vector<1x240x120xf32>
    %49 = vector.shape_cast %48 : vector<1x240x120xf32> to vector<240x120xf32>
    %cst_26 = arith.constant dense<0.000000e+00> : vector<48x120xf32>
    %50 = tpu.matmul %44, %49, %cst_26 {dimension_numbers = #tpu.dot_dimension_numbers<[1], [0], [0], [1], [0, 0, 1, 1], [], []>} : vector<48x240xf32>, vector<240x120xf32>, vector<48x120xf32> -> vector<48x120xf32>
    %51 = arith.maximumf %47, %50 : vector<48x120xf32>
    %c0_27 = arith.constant 0 : index
    %c0_28 = arith.constant 0 : index
    %c0_29 = arith.constant 0 : index
    %52 = vector.load %arg4[%c0_27, %c0_28, %c0_29] : memref<2x24x48xf32, #tpu.memory_space<vmem>>, vector<1x24x48xf32>
    %53 = vector.shape_cast %52 : vector<1x24x48xf32> to vector<24x48xf32>
    %cst_30 = arith.constant dense<0.000000e+00> : vector<24x120xf32>
    %54 = tpu.matmul %53, %51, %cst_30 {dimension_numbers = #tpu.dot_dimension_numbers<[1], [0], [0], [1], [0, 0, 1, 1], [], []>} : vector<24x48xf32>, vector<48x120xf32>, vector<24x120xf32> -> vector<24x120xf32>
    %c1_31 = arith.constant 1 : index
    %c0_32 = arith.constant 0 : index
    %c0_33 = arith.constant 0 : index
    %55 = vector.load %arg4[%c1_31, %c0_32, %c0_33] : memref<2x24x48xf32, #tpu.memory_space<vmem>>, vector<1x24x48xf32>
    %56 = vector.shape_cast %55 : vector<1x24x48xf32> to vector<24x48xf32>
    %cst_34 = arith.constant dense<0.000000e+00> : vector<24x120xf32>
    %57 = tpu.matmul %56, %51, %cst_34 {dimension_numbers = #tpu.dot_dimension_numbers<[1], [0], [0], [1], [0, 0, 1, 1], [], []>} : vector<24x48xf32>, vector<48x120xf32>, vector<24x120xf32> -> vector<24x120xf32>
    %58 = arith.maximumf %54, %57 : vector<24x120xf32>
    %cst_35 = arith.constant 0.000000e+00 : f32
    %59 = vector.broadcast %cst_35 : f32 to vector<24x120xf32>
    %60 = arith.maximumf %58, %59 : vector<24x120xf32>
    %c0_36 = arith.constant 0 : index
    %c0_37 = arith.constant 0 : index
    %61 = vector.load %arg11[%c0_36, %c0_37] : memref<1x160xf32, #tpu.memory_space<vmem>>, vector<1x160xf32>
    %cst_38 = arith.constant 0.000000e+00 : f32
    %62 = vector.broadcast %cst_38 : f32 to vector<16x160xf32>
    %63 = vector.broadcast %61 : vector<1x160xf32> to vector<16x160xf32>
    %64 = arith.addf %63, %62 : vector<16x160xf32>
    %65 = vector.extract_strided_slice %60 {offsets = [0, 0], sizes = [8, 120], strides = [1, 1]} : vector<24x120xf32> to vector<8x120xf32>
    %66 = vector.extract_strided_slice %60 {offsets = [12, 0], sizes = [8, 120], strides = [1, 1]} : vector<24x120xf32> to vector<8x120xf32>
    %67 = tpu.concatenate %65, %66 in 0 : vector<8x120xf32>, vector<8x120xf32> -> vector<16x120xf32>
    %68 = arith.truncf %67 : vector<16x120xf32> to vector<16x120xbf16>
    %c0_39 = arith.constant 0 : index
    %c0_40 = arith.constant 0 : index
    %c0_41 = arith.constant 0 : index
    %69 = vector.load %arg5[%c0_39, %c0_40, %c0_41] : memref<5x120x160xbf16, #tpu.memory_space<vmem>>, vector<1x120x160xbf16>
    %70 = vector.shape_cast %69 : vector<1x120x160xbf16> to vector<120x160xbf16>
    %cst_42 = arith.constant dense<0.000000e+00> : vector<16x160xf32>
    %71 = tpu.matmul %68, %70, %cst_42 {dimension_numbers = #tpu.dot_dimension_numbers<[1], [0], [0], [1], [0, 0, 1, 1], [], []>} : vector<16x120xbf16>, vector<120x160xbf16>, vector<16x160xf32> -> vector<16x160xf32>
    %72 = arith.addf %64, %71 : vector<16x160xf32>
    %73 = vector.extract_strided_slice %60 {offsets = [1, 0], sizes = [8, 120], strides = [1, 1]} : vector<24x120xf32> to vector<8x120xf32>
    %74 = vector.extract_strided_slice %60 {offsets = [13, 0], sizes = [8, 120], strides = [1, 1]} : vector<24x120xf32> to vector<8x120xf32>
    %75 = tpu.concatenate %73, %74 in 0 : vector<8x120xf32>, vector<8x120xf32> -> vector<16x120xf32>
    %76 = arith.truncf %75 : vector<16x120xf32> to vector<16x120xbf16>
    %c1_43 = arith.constant 1 : index
    %c0_44 = arith.constant 0 : index
    %c0_45 = arith.constant 0 : index
    %77 = vector.load %arg5[%c1_43, %c0_44, %c0_45] : memref<5x120x160xbf16, #tpu.memory_space<vmem>>, vector<1x120x160xbf16>
    %78 = vector.shape_cast %77 : vector<1x120x160xbf16> to vector<120x160xbf16>
    %cst_46 = arith.constant dense<0.000000e+00> : vector<16x160xf32>
    %79 = tpu.matmul %76, %78, %cst_46 {dimension_numbers = #tpu.dot_dimension_numbers<[1], [0], [0], [1], [0, 0, 1, 1], [], []>} : vector<16x120xbf16>, vector<120x160xbf16>, vector<16x160xf32> -> vector<16x160xf32>
    %80 = arith.addf %72, %79 : vector<16x160xf32>
    %81 = vector.extract_strided_slice %60 {offsets = [2, 0], sizes = [8, 120], strides = [1, 1]} : vector<24x120xf32> to vector<8x120xf32>
    %82 = vector.extract_strided_slice %60 {offsets = [14, 0], sizes = [8, 120], strides = [1, 1]} : vector<24x120xf32> to vector<8x120xf32>
    %83 = tpu.concatenate %81, %82 in 0 : vector<8x120xf32>, vector<8x120xf32> -> vector<16x120xf32>
    %84 = arith.truncf %83 : vector<16x120xf32> to vector<16x120xbf16>
    %c2_47 = arith.constant 2 : index
    %c0_48 = arith.constant 0 : index
    %c0_49 = arith.constant 0 : index
    %85 = vector.load %arg5[%c2_47, %c0_48, %c0_49] : memref<5x120x160xbf16, #tpu.memory_space<vmem>>, vector<1x120x160xbf16>
    %86 = vector.shape_cast %85 : vector<1x120x160xbf16> to vector<120x160xbf16>
    %cst_50 = arith.constant dense<0.000000e+00> : vector<16x160xf32>
    %87 = tpu.matmul %84, %86, %cst_50 {dimension_numbers = #tpu.dot_dimension_numbers<[1], [0], [0], [1], [0, 0, 1, 1], [], []>} : vector<16x120xbf16>, vector<120x160xbf16>, vector<16x160xf32> -> vector<16x160xf32>
    %88 = arith.addf %80, %87 : vector<16x160xf32>
    %89 = vector.extract_strided_slice %60 {offsets = [3, 0], sizes = [8, 120], strides = [1, 1]} : vector<24x120xf32> to vector<8x120xf32>
    %90 = vector.extract_strided_slice %60 {offsets = [15, 0], sizes = [8, 120], strides = [1, 1]} : vector<24x120xf32> to vector<8x120xf32>
    %91 = tpu.concatenate %89, %90 in 0 : vector<8x120xf32>, vector<8x120xf32> -> vector<16x120xf32>
    %92 = arith.truncf %91 : vector<16x120xf32> to vector<16x120xbf16>
    %c3_51 = arith.constant 3 : index
    %c0_52 = arith.constant 0 : index
    %c0_53 = arith.constant 0 : index
    %93 = vector.load %arg5[%c3_51, %c0_52, %c0_53] : memref<5x120x160xbf16, #tpu.memory_space<vmem>>, vector<1x120x160xbf16>
    %94 = vector.shape_cast %93 : vector<1x120x160xbf16> to vector<120x160xbf16>
    %cst_54 = arith.constant dense<0.000000e+00> : vector<16x160xf32>
    %95 = tpu.matmul %92, %94, %cst_54 {dimension_numbers = #tpu.dot_dimension_numbers<[1], [0], [0], [1], [0, 0, 1, 1], [], []>} : vector<16x120xbf16>, vector<120x160xbf16>, vector<16x160xf32> -> vector<16x160xf32>
    %96 = arith.addf %88, %95 : vector<16x160xf32>
    %97 = vector.extract_strided_slice %60 {offsets = [4, 0], sizes = [8, 120], strides = [1, 1]} : vector<24x120xf32> to vector<8x120xf32>
    %98 = vector.extract_strided_slice %60 {offsets = [16, 0], sizes = [8, 120], strides = [1, 1]} : vector<24x120xf32> to vector<8x120xf32>
    %99 = tpu.concatenate %97, %98 in 0 : vector<8x120xf32>, vector<8x120xf32> -> vector<16x120xf32>
    %100 = arith.truncf %99 : vector<16x120xf32> to vector<16x120xbf16>
    %c4_55 = arith.constant 4 : index
    %c0_56 = arith.constant 0 : index
    %c0_57 = arith.constant 0 : index
    %101 = vector.load %arg5[%c4_55, %c0_56, %c0_57] : memref<5x120x160xbf16, #tpu.memory_space<vmem>>, vector<1x120x160xbf16>
    %102 = vector.shape_cast %101 : vector<1x120x160xbf16> to vector<120x160xbf16>
    %cst_58 = arith.constant dense<0.000000e+00> : vector<16x160xf32>
    %103 = tpu.matmul %100, %102, %cst_58 {dimension_numbers = #tpu.dot_dimension_numbers<[1], [0], [0], [1], [0, 0, 1, 1], [], []>} : vector<16x120xbf16>, vector<120x160xbf16>, vector<16x160xf32> -> vector<16x160xf32>
    %104 = arith.addf %96, %103 : vector<16x160xf32>
    %c0_59 = arith.constant 0 : index
    %c0_60 = arith.constant 0 : index
    %c0_61 = arith.constant 0 : index
    %105 = vector.load %arg6[%c0_59, %c0_60, %c0_61] : memref<2x160x80xf32, #tpu.memory_space<vmem>>, vector<1x160x80xf32>
    %106 = vector.shape_cast %105 : vector<1x160x80xf32> to vector<160x80xf32>
    %cst_62 = arith.constant dense<0.000000e+00> : vector<16x80xf32>
    %107 = tpu.matmul %104, %106, %cst_62 {dimension_numbers = #tpu.dot_dimension_numbers<[1], [0], [0], [1], [0, 0, 1, 1], [], []>} : vector<16x160xf32>, vector<160x80xf32>, vector<16x80xf32> -> vector<16x80xf32>
    %c1_63 = arith.constant 1 : index
    %c0_64 = arith.constant 0 : index
    %c0_65 = arith.constant 0 : index
    %108 = vector.load %arg6[%c1_63, %c0_64, %c0_65] : memref<2x160x80xf32, #tpu.memory_space<vmem>>, vector<1x160x80xf32>
    %109 = vector.shape_cast %108 : vector<1x160x80xf32> to vector<160x80xf32>
    %cst_66 = arith.constant dense<0.000000e+00> : vector<16x80xf32>
    %110 = tpu.matmul %104, %109, %cst_66 {dimension_numbers = #tpu.dot_dimension_numbers<[1], [0], [0], [1], [0, 0, 1, 1], [], []>} : vector<16x160xf32>, vector<160x80xf32>, vector<16x80xf32> -> vector<16x80xf32>
    %111 = arith.maximumf %107, %110 : vector<16x80xf32>
    %c0_67 = arith.constant 0 : index
    %c0_68 = arith.constant 0 : index
    %c0_69 = arith.constant 0 : index
    %112 = vector.load %arg7[%c0_67, %c0_68, %c0_69] : memref<2x8x16xf32, #tpu.memory_space<vmem>>, vector<1x8x16xf32>
    %113 = vector.shape_cast %112 : vector<1x8x16xf32> to vector<8x16xf32>
    %cst_70 = arith.constant dense<0.000000e+00> : vector<8x80xf32>
    %114 = tpu.matmul %113, %111, %cst_70 {dimension_numbers = #tpu.dot_dimension_numbers<[1], [0], [0], [1], [0, 0, 1, 1], [], []>} : vector<8x16xf32>, vector<16x80xf32>, vector<8x80xf32> -> vector<8x80xf32>
    %c1_71 = arith.constant 1 : index
    %c0_72 = arith.constant 0 : index
    %c0_73 = arith.constant 0 : index
    %115 = vector.load %arg7[%c1_71, %c0_72, %c0_73] : memref<2x8x16xf32, #tpu.memory_space<vmem>>, vector<1x8x16xf32>
    %116 = vector.shape_cast %115 : vector<1x8x16xf32> to vector<8x16xf32>
    %cst_74 = arith.constant dense<0.000000e+00> : vector<8x80xf32>
    %117 = tpu.matmul %116, %111, %cst_74 {dimension_numbers = #tpu.dot_dimension_numbers<[1], [0], [0], [1], [0, 0, 1, 1], [], []>} : vector<8x16xf32>, vector<16x80xf32>, vector<8x80xf32> -> vector<8x80xf32>
    %118 = arith.maximumf %114, %117 : vector<8x80xf32>
    %cst_75 = arith.constant 0.000000e+00 : f32
    %119 = vector.broadcast %cst_75 : f32 to vector<8x80xf32>
    %120 = arith.maximumf %118, %119 : vector<8x80xf32>
    %c0_76 = arith.constant 0 : index
    %c0_77 = arith.constant 0 : index
    %121 = vector.load %arg12[%c0_76, %c0_77] : memref<1x50xf32, #tpu.memory_space<vmem>>, vector<1x50xf32>
    %cst_78 = arith.constant 0.000000e+00 : f32
    %122 = vector.broadcast %cst_78 : f32 to vector<2x50xf32>
    %123 = vector.broadcast %121 : vector<1x50xf32> to vector<2x50xf32>
    %124 = arith.addf %123, %122 : vector<2x50xf32>
    %125 = vector.extract_strided_slice %120 {offsets = [0, 0], sizes = [2, 80], strides = [1, 1]} : vector<8x80xf32> to vector<2x80xf32>
    %126 = arith.truncf %125 : vector<2x80xf32> to vector<2x80xbf16>
    %c0_79 = arith.constant 0 : index
    %c0_80 = arith.constant 0 : index
    %c0_81 = arith.constant 0 : index
    %127 = vector.load %arg8[%c0_79, %c0_80, %c0_81] : memref<4x80x50xbf16, #tpu.memory_space<vmem>>, vector<1x80x50xbf16>
    %128 = vector.shape_cast %127 : vector<1x80x50xbf16> to vector<80x50xbf16>
    %cst_82 = arith.constant dense<0.000000e+00> : vector<2x50xf32>
    %129 = tpu.matmul %126, %128, %cst_82 {dimension_numbers = #tpu.dot_dimension_numbers<[1], [0], [0], [1], [0, 0, 1, 1], [], []>} : vector<2x80xbf16>, vector<80x50xbf16>, vector<2x50xf32> -> vector<2x50xf32>
    %130 = arith.addf %124, %129 : vector<2x50xf32>
    %131 = vector.extract_strided_slice %120 {offsets = [2, 0], sizes = [2, 80], strides = [1, 1]} : vector<8x80xf32> to vector<2x80xf32>
    %132 = arith.truncf %131 : vector<2x80xf32> to vector<2x80xbf16>
    %c1_83 = arith.constant 1 : index
    %c0_84 = arith.constant 0 : index
    %c0_85 = arith.constant 0 : index
    %133 = vector.load %arg8[%c1_83, %c0_84, %c0_85] : memref<4x80x50xbf16, #tpu.memory_space<vmem>>, vector<1x80x50xbf16>
    %134 = vector.shape_cast %133 : vector<1x80x50xbf16> to vector<80x50xbf16>
    %cst_86 = arith.constant dense<0.000000e+00> : vector<2x50xf32>
    %135 = tpu.matmul %132, %134, %cst_86 {dimension_numbers = #tpu.dot_dimension_numbers<[1], [0], [0], [1], [0, 0, 1, 1], [], []>} : vector<2x80xbf16>, vector<80x50xbf16>, vector<2x50xf32> -> vector<2x50xf32>
    %136 = arith.addf %130, %135 : vector<2x50xf32>
    %137 = vector.extract_strided_slice %120 {offsets = [4, 0], sizes = [2, 80], strides = [1, 1]} : vector<8x80xf32> to vector<2x80xf32>
    %138 = arith.truncf %137 : vector<2x80xf32> to vector<2x80xbf16>
    %c2_87 = arith.constant 2 : index
    %c0_88 = arith.constant 0 : index
    %c0_89 = arith.constant 0 : index
    %139 = vector.load %arg8[%c2_87, %c0_88, %c0_89] : memref<4x80x50xbf16, #tpu.memory_space<vmem>>, vector<1x80x50xbf16>
    %140 = vector.shape_cast %139 : vector<1x80x50xbf16> to vector<80x50xbf16>
    %cst_90 = arith.constant dense<0.000000e+00> : vector<2x50xf32>
    %141 = tpu.matmul %138, %140, %cst_90 {dimension_numbers = #tpu.dot_dimension_numbers<[1], [0], [0], [1], [0, 0, 1, 1], [], []>} : vector<2x80xbf16>, vector<80x50xbf16>, vector<2x50xf32> -> vector<2x50xf32>
    %142 = arith.addf %136, %141 : vector<2x50xf32>
    %143 = vector.extract_strided_slice %120 {offsets = [6, 0], sizes = [2, 80], strides = [1, 1]} : vector<8x80xf32> to vector<2x80xf32>
    %144 = arith.truncf %143 : vector<2x80xf32> to vector<2x80xbf16>
    %c3_91 = arith.constant 3 : index
    %c0_92 = arith.constant 0 : index
    %c0_93 = arith.constant 0 : index
    %145 = vector.load %arg8[%c3_91, %c0_92, %c0_93] : memref<4x80x50xbf16, #tpu.memory_space<vmem>>, vector<1x80x50xbf16>
    %146 = vector.shape_cast %145 : vector<1x80x50xbf16> to vector<80x50xbf16>
    %cst_94 = arith.constant dense<0.000000e+00> : vector<2x50xf32>
    %147 = tpu.matmul %144, %146, %cst_94 {dimension_numbers = #tpu.dot_dimension_numbers<[1], [0], [0], [1], [0, 0, 1, 1], [], []>} : vector<2x80xbf16>, vector<80x50xbf16>, vector<2x50xf32> -> vector<2x50xf32>
    %148 = arith.addf %142, %147 : vector<2x50xf32>
    %cst_95 = arith.constant 0.000000e+00 : f32
    %149 = vector.broadcast %cst_95 : f32 to vector<2x50xf32>
    %150 = arith.maximumf %148, %149 : vector<2x50xf32>
    %151 = arith.truncf %150 : vector<2x50xf32> to vector<2x50xbf16>
    %c0_96 = arith.constant 0 : index
    %c0_97 = arith.constant 0 : index
    %152 = vector.load %arg9[%c0_96, %c0_97] : memref<50x10xbf16, #tpu.memory_space<vmem>>, vector<50x10xbf16>
    %cst_98 = arith.constant dense<0.000000e+00> : vector<2x10xf32>
    %153 = tpu.matmul %151, %152, %cst_98 {dimension_numbers = #tpu.dot_dimension_numbers<[1], [0], [0], [1], [0, 0, 1, 1], [], []>} : vector<2x50xbf16>, vector<50x10xbf16>, vector<2x10xf32> -> vector<2x10xf32>
    %c0_99 = arith.constant 0 : index
    %c0_100 = arith.constant 0 : index
    %154 = vector.load %arg13[%c0_99, %c0_100] : memref<1x10xf32, #tpu.memory_space<vmem>>, vector<1x10xf32>
    %155 = vector.broadcast %154 : vector<1x10xf32> to vector<2x10xf32>
    %156 = arith.addf %153, %155 : vector<2x10xf32>
    %c0_101 = arith.constant 0 : index
    %c0_102 = arith.constant 0 : index
    %157 = vector.load %arg14[%c0_101, %c0_102] : memref<2x10xf32, #tpu.memory_space<vmem>>, vector<2x10xf32>
    tpu.vector_store %arg14[%c0_101, %c0_102], %156 {strides = array<i32>} : memref<2x10xf32, #tpu.memory_space<vmem>>, vector<2x10xf32>,
    return
  }
  func.func @transform_0(%arg0: i32) -> (i32, i32) {
    %c0_i32 = arith.constant 0 : i32
    %c0_i32_0 = arith.constant 0 : i32
    return %arg0, %c0_i32 : i32, i32
  }
  func.func @transform_1(%arg0: i32) -> (i32, i32, i32) {
    %c0_i32 = arith.constant 0 : i32
    %c0_i32_0 = arith.constant 0 : i32
    %c0_i32_1 = arith.constant 0 : i32
    %c0_i32_2 = arith.constant 0 : i32
    return %c0_i32, %c0_i32_0, %c0_i32_1 : i32, i32, i32
  }
  func.func @transform_2(%arg0: i32) -> (i32, i32, i32) {
    %c0_i32 = arith.constant 0 : i32
    %c0_i32_0 = arith.constant 0 : i32
    %c0_i32_1 = arith.constant 0 : i32
    %c0_i32_2 = arith.constant 0 : i32
    return %c0_i32, %c0_i32_0, %c0_i32_1 : i32, i32, i32
  }
  func.func @transform_3(%arg0: i32) -> (i32, i32, i32) {
    %c0_i32 = arith.constant 0 : i32
    %c0_i32_0 = arith.constant 0 : i32
    %c0_i32_1 = arith.constant 0 : i32
    %c0_i32_2 = arith.constant 0 : i32
    return %c0_i32, %c0_i32_0, %c0_i32_1 : i32, i32, i32
  }
  func.func @transform_4(%arg0: i32) -> (i32, i32, i32) {
    %c0_i32 = arith.constant 0 : i32
    %c0_i32_0 = arith.constant 0 : i32
    %c0_i32_1 = arith.constant 0 : i32
    %c0_i32_2 = arith.constant 0 : i32
    return %c0_i32, %c0_i32_0, %c0_i32_1 : i32, i32, i32
  }
  func.func @transform_5(%arg0: i32) -> (i32, i32, i32) {
    %c0_i32 = arith.constant 0 : i32
    %c0_i32_0 = arith.constant 0 : i32
    %c0_i32_1 = arith.constant 0 : i32
    %c0_i32_2 = arith.constant 0 : i32
    return %c0_i32, %c0_i32_0, %c0_i32_1 : i32, i32, i32
  }
  func.func @transform_6(%arg0: i32) -> (i32, i32, i32) {
    %c0_i32 = arith.constant 0 : i32
    %c0_i32_0 = arith.constant 0 : i32
    %c0_i32_1 = arith.constant 0 : i32
    %c0_i32_2 = arith.constant 0 : i32
    return %c0_i32, %c0_i32_0, %c0_i32_1 : i32, i32, i32
  }
  func.func @transform_7(%arg0: i32) -> (i32, i32, i32) {
    %c0_i32 = arith.constant 0 : i32
    %c0_i32_0 = arith.constant 0 : i32
    %c0_i32_1 = arith.constant 0 : i32
    %c0_i32_2 = arith.constant 0 : i32
    return %c0_i32, %c0_i32_0, %c0_i32_1 : i32, i32, i32
  }
  func.func @transform_8(%arg0: i32) -> (i32, i32) {
    %c0_i32 = arith.constant 0 : i32
    %c0_i32_0 = arith.constant 0 : i32
    %c0_i32_1 = arith.constant 0 : i32
    return %c0_i32, %c0_i32_0 : i32, i32
  }
  func.func @transform_9(%arg0: i32) -> (i32, i32) {
    %c0_i32 = arith.constant 0 : i32
    %c0_i32_0 = arith.constant 0 : i32
    %c0_i32_1 = arith.constant 0 : i32
    return %c0_i32, %c0_i32_0 : i32, i32
  }
  func.func @transform_10(%arg0: i32) -> (i32, i32) {
    %c0_i32 = arith.constant 0 : i32
    %c0_i32_0 = arith.constant 0 : i32
    %c0_i32_1 = arith.constant 0 : i32
    return %c0_i32, %c0_i32_0 : i32, i32
  }
  func.func @transform_11(%arg0: i32) -> (i32, i32) {
    %c0_i32 = arith.constant 0 : i32
    %c0_i32_0 = arith.constant 0 : i32
    %c0_i32_1 = arith.constant 0 : i32
    return %c0_i32, %c0_i32_0 : i32, i32
  }
  func.func @transform_12(%arg0: i32) -> (i32, i32) {
    %c0_i32 = arith.constant 0 : i32
    %c0_i32_0 = arith.constant 0 : i32
    %c0_i32_1 = arith.constant 0 : i32
    return %c0_i32, %c0_i32_0 : i32, i32
  }
  func.func @transform_13(%arg0: i32) -> (i32, i32) {
    %c0_i32 = arith.constant 0 : i32
    %c0_i32_0 = arith.constant 0 : i32
    return %arg0, %c0_i32 : i32, i32
  }
}

</mosaic_0001>

<bundles_post_ra>
// kernel: net_forward.1
= control target key start
LH: loop header
LB: loop body
LE: loop exit
PB: predicated region body
PF: predicated region fallthrough
CT: control target
= control target key end

     0   :  { %vm117_vm0 = vcmask 1045504   ;;  %v3788_v2 = vmov 0   ;;  %vm202_vm1 = vcmask 1046528   ;;  %vm107_vm2 = vcmask 228352   ;;  %s4988_s0 = inlined_call_operand.vmem [shape: f32[56,28], index: 0, kind: input, shape index: {}]   ;;  %s4989_s1 = inlined_call_operand.vmem [shape: bf16[5,28,240], index: 1, kind: input, shape index: {}]   ;;  %s4990_s2 = inlined_call_operand.vmem [shape: f32[2,240,120], index: 2, kind: input, shape index: {}]   ;;  %s4991_s3 = inlined_call_operand.vmem [shape: f32[2,24,48], index: 3, kind: input, shape index: {}]   ;;  %s4992_s4 = inlined_call_operand.vmem [shape: bf16[5,120,160], index: 4, kind: input, shape index: {}]   ;;  %s4993_s5 = inlined_call_operand.vmem [shape: f32[2,160,80], index: 5, kind: input, shape index: {}]   ;;  %s4994_s6 = inlined_call_operand.vmem [shape: f32[2,8,16], index: 6, kind: input, shape index: {}]   ;;  %s4995_s7 = inlined_call_operand.vmem [shape: bf16[4,80,50], index: 7, kind: input, shape index: {}]   ;;  %s4996_s8 = inlined_call_operand.vmem [shape: bf16[50,10], index: 8, kind: input, shape index: {}]   ;;  %s4997_s9 = inlined_call_operand.vmem [shape: f32[1,240], index: 9, kind: input, shape index: {}]   ;;  %s4998_s10 = inlined_call_operand.vmem [shape: f32[1,160], index: 10, kind: input, shape index: {}]   ;;  %s4999_s11 = inlined_call_operand.vmem [shape: f32[1,50], index: 11, kind: input, shape index: {}]   ;;  %s5000_s12 = inlined_call_operand.vmem [shape: f32[1,10], index: 12, kind: input, shape index: {}]   ;;  %s5001_s13 = inlined_call_operand.hbm [shape: f32[2,10], index: 13, kind: output, shape index: {}]  }
   0x1   :  { %v3595_v0 = vld [vmem:[%s4989_s1 + $0x24] ss:$8 sps:$4 sm:$0xff]   ;;  %v3597_v1 = vld [vmem:[%s4989_s1 + $0x20] ss:$8 sps:$4 sm:$0xff]   ;;  %297 = vmatprep.mubr.bf16.mxu0 %v3788_v2  ;;  %156 = vmatprep.mubr.bf16.mxu1 %v3788_v2  ;;  %v3890_v7 = vld [vmem:[%s4988_s0 + $0x10] sm:$0xff]  ;;  %vm213_vm3 = vcmask 1042432  }
   0x2   :  { %265 = vmatprep.subr.bf16.mxu0 %v3595_v0  ;;  %v3598_v3 = vld [vmem:[%s4989_s1 + $0x34] ss:$8 sps:$4 sm:$0x3f]   ;;  %v3600_v4 = vld [vmem:[%s4989_s1 + $0x30] ss:$8 sps:$4 sm:$0x3f]  }
   0x3   :  { %266 = vmatpush1.bf16.msra.mxu0 %v3597_v1  ;;  %v3880_v5 = vld [vmem:[%s4988_s0] sm:$0xff]  ;;  %v3885_v6 = vld [vmem:[%s4988_s0 + $0x8] sm:$0xff]  ;;  %v260_v8 = vsel %vm117_vm0, %v3600_v4, 0  ;;  %v206_v11 = vrot.slane %v3890_v7, 1  ;;  %v3903_v13 = vld [vmem:[%s4988_s0 + $0x18] sm:$0xff]  ;;  %vm71_vm4 = vcmask 1043456  }
   0x4   :  { %2817 = vmatprep.subr.msk.bf16.mxu0 %vm117_vm0, %v3598_v3  ;;  %v203_v9 = vrot.slane %v3880_v5, 1  ;;  %v204_v10 = vrot.slane %v3885_v6, 1  ;;  %v3603_v12 = vld [vmem:[%s4989_s1 + $0x44] ss:$8 sps:$4 sm:$0xff]   ;;  %v3601_v16 = vld [vmem:[%s4989_s1 + $0x40] ss:$8 sps:$4 sm:$0xff]   ;;  %v82_v46 = vpack.c.bf16 %v3885_v6, %v3880_v5 }
   0x5   :  { %v3913_v17 = vld [vmem:[%s4988_s0 + $0x20] sm:$0xff]  ;;  %v208_v18 = vrot.slane %v3903_v13, 1  ;;  %v3919_v19 = vld [vmem:[%s4988_s0 + $0x28] sm:$0xff]  ;;  %v214_v21 = vrot.slane %v3903_v13, 5  ;;  %v3926_v23 = vld [vmem:[%s4988_s0 + $0x30] sm:$0xff]  ;;  %v340_v40 = vrot.slane %v3880_v5, 2 }
   0x6   :  { %v205_v14 = vsel %vm202_vm1, %v203_v9, %v204_v10  ;;  %v207_v15 = vsel %vm202_vm1, %v204_v10, %v206_v11  ;;  %v215_v22 = vrot.slane %v3913_v17, 5  ;;  %v3604_v24 = vld [vmem:[%s4989_s1 + $0x54] ss:$8 sps:$4 sm:$0x3f]   ;;  %v626_v26 = vpack.c.bf16 %v3926_v23, %v3919_v19  ;;  %v3609_v30 = vld [vmem:[%s4989_s1 + $0x64] ss:$8 sps:$4 sm:$0xff]  }
   0x7   :  { %268 = vmatpush1.bf16.msra.mxu0 %v260_v8  ;;  %v224_v20 = vpack.c.bf16 %v207_v15, %v205_v14  ;;  %v3606_v25 = vld [vmem:[%s4989_s1 + $0x50] ss:$8 sps:$4 sm:$0x3f]   ;;  %v209_v27 = vsel %vm202_vm1, %v206_v11, %v208_v18  ;;  %v217_v32 = vrot.slane %v3919_v19, 5  ;;  %v219_v33 = vrot.slane %v3926_v23, 5  ;;  %v740_v43 = vld [vmem:[%s4990_s2] sm:$0xff] }
   0x8   :  { %402 = vmatprep.subr.bf16.mxu0 %v3603_v12  ;;  %v216_v28 = vsel %vm213_vm3, %v214_v21, %v215_v22  ;;  %v397_v29 = vsel %vm117_vm0, %v3606_v25, 0  ;;  %v3616_v34 = vld [vmem:[%s4989_s1 + $0x4] ss:$8 sps:$4 sm:$0xff]   ;;  %v3618_v35 = vld [vmem:[%s4989_s1] ss:$8 sps:$4 sm:$0xff]   ;;  %v615_v42 = vrot.slane %v3880_v5, 4 }
   0x9   :  { %v225_v31 = vpack.c.bf16 %v216_v28, %v209_v27  ;;  %124 = vmatprep.subr.bf16.mxu1 %v3616_v34  ;;  %v3619_v36 = vld [vmem:[%s4989_s1 + $0x14] ss:$8 sps:$4 sm:$0x3f]   ;;  %v3621_v37 = vld [vmem:[%s4989_s1 + $0x10] ss:$8 sps:$4 sm:$0x3f]   ;;  %v218_v38 = vsel %vm213_vm3, %v215_v22, %v217_v32  ;;  %v220_v39 = vsel %vm213_vm3, %v217_v32, %v219_v33 }
   0xa   :  { %2818 = vmatmul.mubr.msk.bf16.vlgmr.msra.gmra.mrb[0].mxu0 %vm107_vm2, %v224_v20  ;;  %125 = vmatpush1.bf16.msra.mxu1 %v3618_v35  ;;  %v119_v41 = vsel %vm117_vm0, %v3621_v37, 0  ;;  %v741_v44 = vld [vmem:[%s4990_s2 + $0x8] sm:$0xff]  ;;  %v341_v45 = vrot.slane %v3885_v6, 2  ;;  %v616_v47 = vrot.slane %v3885_v6, 4  ;;  %v618_v48 = vrot.slane %v3890_v7, 4  ;;  %v742_v59 = vld [vmem:[%s4990_s2 + $0x10] sm:$0xff] }
   0xb   :  { %403 = vmatpush1.bf16.msra.mxu0 %v3601_v16  ;;  %307 = vmatprep.mubr.bf16.mxu0 %v3788_v2  ;;  %v226_v49 = vpack.c.bf16 %v220_v39, %v218_v38  ;;  %v343_v50 = vrot.slane %v3890_v7, 2  ;;  %v72_v51 = vrot.slane %v3903_v13, 4  ;;  %v73_v52 = vrot.slane %v3913_v17, 4  ;;  %v743_v60 = vld [vmem:[%s4990_s2 + $0x18] sm:$0xff]  ;;  %v744_v3 = vld [vmem:[%s4990_s2 + $0x20] sm:$0xff]  ;;  %v745_v9 = vld [vmem:[%s4990_s2 + $0x28] sm:$0xff] }
   0xc   :  { %2829 = vmatprep.subr.msk.bf16.mxu0 %vm117_vm0, %v3604_v24  ;;  %2805 = vmatprep.subr.msk.bf16.mxu1 %vm117_vm0, %v3619_v36  ;;  %v3982_v53 = vsel %vm71_vm4, %v615_v42, %v616_v47  ;;  %v3985_v54 = vsel %vm71_vm4, %v616_v47, %v618_v48  ;;  %v3324_v55 = vpack.c.bf16 %v741_v44, %v740_v43  ;;  %v3789_v58 = vmov 0.0|0.0   ;;  %v3607_v4 = vld [vmem:[%s4989_s1 + $0x60] ss:$8 sps:$4 sm:$0xff]   ;;  %v3610_v11 = vld [vmem:[%s4989_s1 + $0x74] ss:$8 sps:$4 sm:$0x3f]  }
   0xd   :  { %v624_v56 = vpack.c.bf16 %v3985_v54, %v3982_v53  ;;  %v3990_v57 = vsel %vm71_vm4, %v618_v48, %v72_v51  ;;  %v74_v62 = vsel %vm71_vm4, %v72_v51, %v73_v52  ;;  %v342_v63 = vsel %vm117_vm0, %v340_v40, %v341_v45  ;;  %v3612_v12 = vld [vmem:[%s4989_s1 + $0x70] ss:$8 sps:$4 sm:$0x3f]   ;;  %v3615_v25 = vld [vmem:[%s4989_s1 + $0x84] ss:$8 sps:$4 sm:$0xff]  }
   0xe   :  { %127 = vmatpush1.bf16.msra.mxu1 %v119_v41  ;;  %v625_v61 = vpack.c.bf16 %v3913_v17, %v3990_v57  ;;  %v344_v0 = vsel %vm117_vm0, %v341_v45, %v343_v50  ;;  %v3327_v1 = vpack.c.bf16 %v743_v60, %v742_v59  ;;  %v83_v8 = vpack.c.bf16 %v74_v62, %v3890_v7  ;;  %v746_v21 = vld [vmem:[%s4990_s2 + $0x30] sm:$0xff]  ;;  %v747_v22 = vld [vmem:[%s4990_s2 + $0x38] sm:$0xff]  ;;  %v749_v32 = vld [vmem:[%s4990_s2 + $0x48] sm:$0xff] }
   0xf   :  { %405 = vmatpush1.bf16.msra.mxu0 %v397_v29  ;;  %3323 = vmatprep.subr.bf16.mxu1 %v3789_v58  ;;  %v361_v10 = vpack.c.bf16 %v344_v0, %v342_v63  ;;  %v75_v14 = vrot.slane %v3919_v19, 4  ;;  %v77_v15 = vrot.slane %v3926_v23, 4  ;;  %v345_v16 = vrot.slane %v3903_v13, 2  ;;  %v750_v39 = vld [vmem:[%s4990_s2 + $0x50] sm:$0xff]  ;;  %v751_v40 = vld [vmem:[%s4990_s2 + $0x58] sm:$0xff]  ;;  %v752_v44 = vld [vmem:[%s4990_s2 + $0x60] sm:$0xff] }
  0x10   :  { %540 = vmatprep.subr.bf16.mxu0 %v3609_v30  ;;  %v351_v18 = vrot.slane %v3903_v13, 6  ;;  %v352_v20 = vrot.slane %v3913_v17, 6  ;;  %vm350_vm5 = vcmask 1041408   ;;  %v3330_v24 = vpack.c.bf16 %v745_v9, %v744_v3  ;;  %v753_v45 = vld [vmem:[%s4990_s2 + $0x68] sm:$0xff]  ;;  %v756_v0 = vld [vmem:[%s4990_s2 + $0x80] sm:$0xff] }
  0x11   :  { %2806 = vmatmul.mubr.msk.bf16.vlgmr.msra.gmra.mrb[0].mxu1 %vm107_vm2, %v82_v46  ;;  %v76_v27 = vsel %vm71_vm4, %v73_v52, %v75_v14  ;;  %v78_v28 = vsel %vm71_vm4, %v75_v14, %v77_v15  ;;  %v346_v29 = vsel %vm117_vm0, %v343_v50, %v345_v16  ;;  %v535_v33 = vsel %vm117_vm0, %v3612_v12, 0  ;;  %v3624_v50 = vld [vmem:[%s4989_s1 + $0x90] ss:$8 sps:$4 sm:$0x3f]  }
  0x12   :  { %2819 = vmatmul.mubr.msk.bf16.gmra.mrb[4].mxu0 %vm107_vm2, %v225_v31  ;;  %166 = vmatprep.mubr.bf16.mxu1 %v3788_v2  ;;  %v353_v30 = vsel %vm350_vm5, %v351_v18, %v352_v20  ;;  %v748_v31 = vld [vmem:[%s4990_s2 + $0x40] sm:$0xff]  ;;  %v3333_v34 = vpack.c.bf16 %v747_v22, %v746_v21  ;;  %v84_v35 = vpack.c.bf16 %v78_v28, %v76_v27  ;;  %v354_v37 = vrot.slane %v3919_v19, 6  ;;  %v754_v52 = vld [vmem:[%s4990_s2 + $0x70] sm:$0xff]  ;;  %v759_v12 = vld [vmem:[%s4990_s2 + $0x98] sm:$0xff] }
  0x13   :  { %317 = vmatprep.mubr.bf16.mxu0 %v3788_v2  ;;  %3325 = vmatpush1.bf16.msra.mxu1 %v3324_v55  ;;  %v362_v36 = vpack.c.bf16 %v353_v30, %v346_v29  ;;  %v356_v38 = vrot.slane %v3926_v23, 6  ;;  %v3336_v41 = vpack.c.bf16 %v749_v32, %v748_v31  ;;  %v3339_v46 = vpack.c.bf16 %v751_v40, %v750_v39  ;;  %v755_v55 = vld [vmem:[%s4990_s2 + $0x78] sm:$0xff]  ;;  %v760_v18 = vld [vmem:[%s4990_s2 + $0xa0] sm:$0xff] }
  0x14   :  { %3326 = vmatprep.subr.bf16.mxu1 %v3789_v58  ;;  %v355_v42 = vsel %vm350_vm5, %v352_v20, %v354_v37  ;;  %v478_v48 = vrot.slane %v3880_v5, 3  ;;  %vm477_vm6 = vcmask 1044480   ;;  %v481_v51 = vrot.slane %v3890_v7, 3  ;;  %v761_v20 = vld [vmem:[%s4990_s2 + $0xa8] sm:$0xff] }
  0x15   :  { %v357_v43 = vsel %vm350_vm5, %v354_v37, %v356_v38  ;;  %v3342_v59 = vpack.c.bf16 %v753_v45, %v752_v44  ;;  %vm488_vm7 = vcmask 1040384   ;;  %v489_v60 = vrot.slane %v3903_v13, 7 }
  0x16   :  { %v363_v47 = vpack.c.bf16 %v357_v43, %v355_v42  ;;  %v490_v62 = vrot.slane %v3913_v17, 7  ;;  %v492_v63 = vrot.slane %v3919_v19, 7  ;;  %v494_v3 = vrot.slane %v3926_v23, 7 }
  0x17   :  { %3328 = vmatpush1.bf16.msra.mxu1 %v3327_v1  ;;  %v757_v1 = vld [vmem:[%s4990_s2 + $0x88] sm:$0xff]  ;;  %v3354_v27 = vpack.c.bf16 %v761_v20, %v760_v18 }
  0x18   :  { %3329 = vmatprep.subr.bf16.mxu1 %v3789_v58  ;;  %v3348_v14 = vpack.c.bf16 %v757_v1, %v756_v0  ;;  %v491_v16 = vsel %vm488_vm7, %v489_v60, %v490_v62  ;;  %v493_v28 = vsel %vm488_vm7, %v490_v62, %v492_v63  ;;  %v495_v29 = vsel %vm488_vm7, %v492_v63, %v494_v3 }
  0x19   :  { %2807 = vmatmul.mubr.msk.bf16.gmra.mrb[4].mxu1 %vm107_vm2, %v83_v8  ;;  %v3345_v8 = vpack.c.bf16 %v755_v55, %v754_v52 }
  0x1a   :  { %2820 = vmatmul.mubr.msk.bf16.gmra.mrb[8].mxu0 %vm107_vm2, %v226_v49  ;;  %176 = vmatprep.mubr.bf16.mxu1 %v3788_v2  ;;  %v479_v49 = vrot.slane %v3885_v6, 3  ;;  %v483_v6 = vrot.slane %v3903_v13, 3  ;;  %v3613_v13 = vld [vmem:[%s4989_s1 + $0x80] ss:$8 sps:$4 sm:$0xff]  }
  0x1b   :  { %434 = vmatprep.mubr.bf16.mxu0 %v3788_v2  ;;  %3331 = vmatpush1.bf16.msra.mxu1 %v3330_v24  ;;  %v762_v24 = vld [vmem:[%s4990_s2 + $0xb0] sm:$0xff] }
  0x1c   :  { %3332 = vmatprep.subr.bf16.mxu1 %v3789_v58  ;;  %v480_v5 = vsel %vm477_vm6, %v478_v48, %v479_v49  ;;  %v482_v7 = vsel %vm477_vm6, %v479_v49, %v481_v51  ;;  %v484_v15 = vsel %vm477_vm6, %v481_v51, %v483_v6 }
  0x1d   :  { %v499_v9 = vpack.c.bf16 %v482_v7, %v480_v5  ;;  %v500_v22 = vpack.c.bf16 %v491_v16, %v484_v15 }
  0x1f   :  { %3334 = vmatpush1.bf16.msra.mxu1 %v3333_v34 }
  0x20   :  { %3335 = vmatprep.subr.bf16.mxu1 %v3789_v58 }
  0x21   :  { %2808 = vmatmul.mubr.msk.bf16.gmra.mrb[8].mxu1 %vm107_vm2, %v84_v35 }
  0x22   :  { %2830 = vmatmul.mubr.msk.bf16.vlgmr.msra.gmra.mrb[0].mxu0 %vm107_vm2, %v361_v10  ;;  %v3622_v10 = vld [vmem:[%s4989_s1 + $0x94] ss:$8 sps:$4 sm:$0x3f]  }
  0x23   :  { %541 = vmatpush1.bf16.msra.mxu0 %v3607_v4  ;;  %444 = vmatprep.mubr.bf16.mxu0 %v3788_v2  ;;  %v660_v4 = vsel %vm117_vm0, %v3624_v50, 0 }
  0x24   :  { %2841 = vmatprep.subr.msk.bf16.mxu0 %vm117_vm0, %v3610_v11  ;;  %3337 = vmatpush1.bf16.msra.mxu1 %v3336_v41  ;;  %v758_v11 = vld [vmem:[%s4990_s2 + $0x90] sm:$0xff] }
  0x25   :  { %3338 = vmatprep.subr.bf16.mxu1 %v3789_v58  ;;  %v3351_v21 = vpack.c.bf16 %v759_v12, %v758_v11 }
  0x27   :  { %543 = vmatpush1.bf16.msra.mxu0 %v535_v33 }
  0x28   :  { %665 = vmatprep.subr.bf16.mxu0 %v3615_v25  ;;  %3340 = vmatpush1.bf16.msra.mxu1 %v3339_v46  ;;  %v763_v25 = vld [vmem:[%s4990_s2 + $0xb8] sm:$0xff] }
  0x29   :  { %3341 = vmatprep.subr.bf16.mxu1 %v3789_v58  ;;  %v3357_v30 = vpack.c.bf16 %v763_v25, %v762_v24 }
  0x2a   :  { %2831 = vmatmul.mubr.msk.bf16.gmra.mrb[4].mxu0 %vm107_vm2, %v362_v36 }
  0x2b   :  { %454 = vmatprep.mubr.bf16.mxu0 %v3788_v2 }
  0x2c   :  { %3343 = vmatpush1.bf16.msra.mxu1 %v3342_v59 }
  0x2d   :  { %3344 = vmatprep.subr.bf16.mxu1 %v3789_v58 }
  0x30   :  { %3346 = vmatpush1.bf16.msra.mxu1 %v3345_v8 }
  0x31   :  { %3347 = vmatprep.subr.bf16.mxu1 %v3789_v58 }
  0x32   :  { %2832 = vmatmul.mubr.msk.bf16.gmra.mrb[8].mxu0 %vm107_vm2, %v363_v47 }
  0x33   :  { %572 = vmatprep.mubr.bf16.mxu0 %v3788_v2 }
  0x34   :  { %3349 = vmatpush1.bf16.msra.mxu1 %v3348_v14 }
  0x35   :  { %3350 = vmatprep.subr.bf16.mxu1 %v3789_v58 }
  0x38   :  { %3352 = vmatpush1.bf16.msra.mxu1 %v3351_v21 }
  0x39   :  { %3353 = vmatprep.subr.bf16.mxu1 %v3789_v58 }
  0x3a   :  { %2842 = vmatmul.mubr.msk.bf16.vlgmr.msra.gmra.mrb[0].mxu0 %vm107_vm2, %v499_v9 }
  0x3b   :  { %666 = vmatpush1.bf16.msra.mxu0 %v3613_v13  ;;  %582 = vmatprep.mubr.bf16.mxu0 %v3788_v2 }
  0x3c   :  { %2853 = vmatprep.subr.msk.bf16.mxu0 %vm117_vm0, %v3622_v10  ;;  %3355 = vmatpush1.bf16.msra.mxu1 %v3354_v27 }
  0x3f   :  { %668 = vmatpush1.bf16.msra.mxu0 %v660_v4 }
  0x40   :  { %3413 = vmatprep.subr.bf16.mxu0 %v3789_v58 }
  0x42   :  { %2843 = vmatmul.mubr.msk.bf16.gmra.mrb[4].mxu0 %vm107_vm2, %v500_v22 }
  0x43   :  { %592 = vmatprep.mubr.bf16.mxu0 %v3788_v2 }
  0x44   :  { %18 = vsyncpa [#allocation3], 0  ;;  %3356 = vmatprep.subr.bf16.mxu1 %v3789_v58  ;;  %v764_v31 = vld [vmem:[%s4990_s2 + $0xc0] sm:$0xff]  ;;  %v765_v32 = vld [vmem:[%s4990_s2 + $0xc8] sm:$0xff]  ;;  %v501_v33 = vpack.c.bf16 %v495_v29, %v493_v28  ;;  %v55_v44 = vlaneseq  ;;  %vm770_vm8 = vcmask 916480   ;;  %vm3790_vm9 = vmmov 0  }
  0x45   :  { %3358 = vmatpush1.bf16.msra.mxu1 %v3357_v30  ;;  %v3360_v34 = vpack.c.bf16 %v765_v32, %v764_v31  ;;  %v766_v53 = vld [vmem:[%s4990_s2 + $0xd0] sm:$0xff]  ;;  %v767_v54 = vld [vmem:[%s4990_s2 + $0xd8] sm:$0xff]  ;;  %v768_v17 = vld [vmem:[%s4990_s2 + $0xe0] sm:$0xff]  ;;  %vm1019_vm10 = vcmask 392192   ;;  %vm1319_vm11 = vcmask 982016   ;;  %vm2016_vm12 = vcmask 261120  }
  0x46   :  { %3359 = vmatprep.subr.bf16.mxu1 %v3789_v58  ;;  %v769_v19 = vld [vmem:[%s4990_s2 + $0xe8] sm:$0xff]  ;;  %v4186_v45 = vshrl.u32 %v55_v44, 7  ;;  %v53_v47 = vld [vmem:[%s4997_s9] sm:$0x3]  ;;  %v2863_v55 = vld [vmem:[%s4990_s2 + $0xf0] sm:$0xff]  ;;  %vm2197_vm13 = vcmask 130048  }
  0x47   :  { %v3366_v23 = vpack.c.bf16 %v769_v19, %v768_v17  ;;  %v2864_v59 = vld [vmem:[%s4990_s2 + $0xf8] sm:$0xff]  ;;  %v2865_v8 = vld [vmem:[%s4990_s2 + $0x100] sm:$0xff]  ;;  %v2866_v13 = vld [vmem:[%s4990_s2 + $0x108] sm:$0xff]  ;;  %vm2397_vm14 = vcmask 654336   ;;  %vm2738_vm15 = vcmask 408576  }
  0x48   :  { %v57_v46 = vsub.s32 0, %v4186_v45  ;;  %v61_v48 = vsub.s32 1, %v4186_v45  ;;  %v3369_v1 = vpack.c.bf16 %v2864_v59, %v2863_v55  ;;  %v3372_v12 = vpack.c.bf16 %v2866_v13, %v2865_v8  ;;  %v2867_v15 = vld [vmem:[%s4990_s2 + $0x110] sm:$0xff]  ;;  %v2868_v16 = vld [vmem:[%s4990_s2 + $0x118] sm:$0xff]  ;;  %v2869_v30 = vld [vmem:[%s4990_s2 + $0x120] sm:$0xff] }
  0x49   :  { %3361 = vmatpush1.bf16.msra.mxu1 %v3360_v34  ;;  %v3375_v27 = vpack.c.bf16 %v2868_v16, %v2867_v15  ;;  %v2870_v31 = vld [vmem:[%s4990_s2 + $0x128] sm:$0xff]  ;;  %v2872_v17 = vld [vmem:[%s4990_s2 + $0x138] sm:$0xff]  ;;  %v2887_v13 = vld [vmem:[%s4990_s2 + $0x1b0] sm:$0xff] }
  0x4a   :  { %2844 = vmatmul.mubr.msk.bf16.gmra.mrb[8].mxu0 %vm107_vm2, %v501_v33  ;;  %3362 = vmatprep.subr.bf16.mxu1 %v3789_v58  ;;  %v58_v49 = vrot.slane %v53_v47, %v57_v46  ;;  %v62_v50 = vrot.slane %v53_v47, %v61_v48  ;;  %v2876_v44 = vld [vmem:[%s4990_s2 + $0x158] sm:$0xff]  ;;  %v2891_v16 = vld [vmem:[%s4990_s2 + $0x1d0] sm:$0xff] }
  0x4b   :  { %697 = vmatprep.mubr.bf16.mxu0 %v3788_v2  ;;  %v2880_v55 = vld [vmem:[%s4990_s2 + $0x178] sm:$0xff]  ;;  %v3062_v45 = vld [vmem:[%s4993_s5 + $0xb0] sm:$0xff] }
  0x52   :  { %2854 = vmatmul.mubr.msk.bf16.vlgmr.msra.gmra.mrb[0].mxu0 %vm107_vm2, %v624_v56  ;;  %v3363_v56 = vpack.c.bf16 %v767_v54, %v766_v53  ;;  %v3378_v53 = vpack.c.bf16 %v2870_v31, %v2869_v30 }
  0x53   :  { %707 = vmatprep.mubr.bf16.mxu0 %v3788_v2 }
  0x54   :  { %3364 = vmatpush1.bf16.msra.mxu1 %v3363_v56  ;;  %v2871_v56 = vld [vmem:[%s4990_s2 + $0x130] sm:$0xff] }
  0x55   :  { %3365 = vmatprep.subr.bf16.mxu1 %v3789_v58 }
  0x58   :  { %3367 = vmatpush1.bf16.msra.mxu1 %v3366_v23 }
  0x59   :  { %3368 = vmatprep.subr.bf16.mxu1 %v3789_v58 }
  0x5a   :  { %2855 = vmatmul.mubr.msk.bf16.gmra.mrb[4].mxu0 %vm107_vm2, %v625_v61 }
  0x5b   :  { %717 = vmatprep.mubr.bf16.mxu0 %v3788_v2 }
  0x62   :  { %2856 = vmatmul.mubr.msk.bf16.gmra.mrb[8].mxu0 %vm107_vm2, %v626_v26 }
  0xe4   :  { %v158_v26 = vpop.f32.mrb[0].mxu1 }
  0xe5   :  { %v160_v57 = vpop.f32.mrb[1].mxu1  ;;  %v187_v51 = vadd.f32 %v158_v26, %v58_v49 }
  0xe6   :  { %v162_v61 = vpop.f32.mrb[2].mxu1  ;;  %v188_v52 = vadd.f32 %v160_v57, %v62_v50 }
  0xe7   :  { %v164_v35 = vpop.f32.mrb[3].mxu1  ;;  %v189_v6 = vadd.f32 %v162_v61, %v58_v49 }
  0xe8   :  { %v190_v62 = vadd.f32 %v164_v35, %v62_v50 }
  0xec   :  { %v168_v36 = vpop.f32.mrb[4].mxu1 }
  0xed   :  { %v170_v37 = vpop.f32.mrb[5].mxu1  ;;  %v191_v10 = vadd.f32 %v168_v36, %v58_v49  ;;  %v3381_v36 = vpack.c.bf16 %v2872_v17, %v2871_v56 }
  0xee   :  { %v172_v38 = vpop.f32.mrb[6].mxu1  ;;  %v192_v11 = vadd.f32 %v170_v37, %v62_v50 }
  0xef   :  { %v174_v39 = vpop.f32.mrb[7].mxu1  ;;  %v193_v14 = vadd.f32 %v172_v38, %v58_v49 }
  0xf0   :  { %v194_v20 = vadd.f32 %v174_v39, %v62_v50  ;;  %v2873_v39 = vld [vmem:[%s4990_s2 + $0x140] sm:$0xff] }
  0xf4   :  { %v178_v40 = vpop.f32.mrb[8].mxu1 }
  0xf5   :  { %v180_v41 = vpop.f32.mrb[9].mxu1  ;;  %v195_v33 = vadd.f32 %v178_v40, %v58_v49  ;;  %v2874_v40 = vld [vmem:[%s4990_s2 + $0x148] sm:$0xff] }
  0xf6   :  { %v182_v42 = vpop.f32.mrb[10].mxu1  ;;  %v196_v34 = vadd.f32 %v180_v41, %v62_v50 }
  0xf7   :  { %v4184_v43 = vpop.f32.mrb[11].mxu1  ;;  %v197_v54 = vadd.f32 %v182_v42, %v58_v49  ;;  %v3384_v42 = vpack.c.bf16 %v2874_v40, %v2873_v39  ;;  %v2877_v49 = vld [vmem:[%s4990_s2 + $0x160] sm:$0xff] }
  0xf8   :  { %v198_v23 = vadd.f32 %v4184_v43, %v62_v50  ;;  %v2875_v43 = vld [vmem:[%s4990_s2 + $0x150] sm:$0xff]  ;;  %v2878_v50 = vld [vmem:[%s4990_s2 + $0x168] sm:$0xff] }
  0xf9   :  { %v3387_v47 = vpack.c.bf16 %v2876_v44, %v2875_v43 }
 0x125   :  { %v699_v5 = vpop.f32.mrb[0].mxu0 }
 0x126   :  { %v4203_v7 = vadd.f32 %v699_v5, %v187_v51  ;;  %v701_v60 = vpop.f32.mrb[1].mxu0  ;;  %v3390_v51 = vpack.c.bf16 %v2878_v50, %v2877_v49  ;;  %v2881_v5 = vld [vmem:[%s4990_s2 + $0x180] sm:$0xff] }
 0x127   :  { %v4205_v63 = vadd.f32 %v701_v60, %v188_v52  ;;  %v703_v0 = vpop.f32.mrb[2].mxu0  ;;  %v2879_v52 = vld [vmem:[%s4990_s2 + $0x170] sm:$0xff]  ;;  %v1016_v50 = vld [vmem:[%s4991_s3] sm:$0xff] }
 0x128   :  { %v4207_v3 = vadd.f32 %v703_v0, %v189_v6  ;;  %v705_v4 = vpop.f32.mrb[3].mxu0  ;;  %v3393_v59 = vpack.c.bf16 %v2880_v55, %v2879_v52  ;;  %v2882_v6 = vld [vmem:[%s4990_s2 + $0x188] sm:$0xff]  ;;  %v1018_v52 = vld [vmem:[%s4991_s3 + $0x10] sm:$0xff]  ;;  %v2902_v55 = vld [vmem:[%s4991_s3 + $0x18] sm:$0xff] }
 0x129   :  { %v4215_v9 = vadd.f32 %v705_v4, %v190_v62  ;;  %2857 = vmatprep.mubr.msk.f32.mxu1 %vm770_vm8, %v4205_v63  ;;  %v3396_v60 = vpack.c.bf16 %v2882_v6, %v2881_v5  ;;  %v2883_v62 = vld [vmem:[%s4990_s2 + $0x190] sm:$0xff]  ;;  %v2886_v4 = vld [vmem:[%s4990_s2 + $0x1a8] sm:$0xff] }
 0x12a   :  { %854 = vmatmul.mubr.f32.vlgmr.msra.gmra.mrb[12].mxu1 %v4203_v7  ;;  %v2904_v5 = vld [vmem:[%s4991_s3 + $0x28] sm:$0xff]  ;;  %v3630_v6 = vld [vmem:[%s4992_s4 + $0x14] ss:$8 sps:$4 sm:$0xff]  }
 0x12b   :  { %3370 = vmatpush1.bf16.msra.mxu1 %v3369_v1  ;;  %2858 = vmatprep.mubr.msk.f32.mxu1 %vm770_vm8, %v4215_v9  ;;  %v2885_v1 = vld [vmem:[%s4990_s2 + $0x1a0] sm:$0xff] }
 0x12c   :  { %3371 = vmatprep.subr.bf16.mxu1 %v3789_v58  ;;  %v3402_v8 = vpack.c.bf16 %v2886_v4, %v2885_v1  ;;  %v3634_v1 = vld [vmem:[%s4992_s4 + $0x30] ss:$8 sps:$4 sm:$0xff]   ;;  %v3639_v4 = vld [vmem:[%s4992_s4 + $0x44] ss:$8 sps:$4 sm:$0xff]  }
 0x12d   :  { %v709_v18 = vpop.f32.mrb[4].mxu0 }
 0x12e   :  { %v4229_v21 = vadd.f32 %v709_v18, %v191_v10  ;;  %v711_v22 = vpop.f32.mrb[5].mxu0  ;;  %859 = vmatmul.mubr.f32.gmra.mrb[14].mxu1 %v4207_v3  ;;  %v2888_v10 = vld [vmem:[%s4990_s2 + $0x1b8] sm:$0xff] }
 0x12f   :  { %v4232_v24 = vadd.f32 %v711_v22, %v192_v11  ;;  %3373 = vmatpush1.bf16.msra.mxu1 %v3372_v12  ;;  %v713_v25 = vpop.f32.mrb[6].mxu0  ;;  %v3405_v11 = vpack.c.bf16 %v2888_v10, %v2887_v13  ;;  %v2889_v12 = vld [vmem:[%s4990_s2 + $0x1c0] sm:$0xff]  ;;  %v2892_v18 = vld [vmem:[%s4990_s2 + $0x1d8] sm:$0xff] }
 0x130   :  { %v4234_v28 = vadd.f32 %v713_v25, %v193_v14  ;;  %v715_v29 = vpop.f32.mrb[7].mxu0  ;;  %3374 = vmatprep.subr.bf16.mxu1 %v3789_v58  ;;  %v2890_v14 = vld [vmem:[%s4990_s2 + $0x1c8] sm:$0xff]  ;;  %v3642_v13 = vld [vmem:[%s4992_s4 + $0x54] ss:$8 sps:$4 sm:$0xff]   ;;  %v3640_v10 = vld [vmem:[%s4992_s4 + $0x50] ss:$8 sps:$4 sm:$0xff]  }
 0x131   :  { %v4243_v32 = vadd.f32 %v715_v29, %v194_v20  ;;  %2859 = vmatprep.mubr.msk.f32.mxu1 %vm770_vm8, %v4232_v24  ;;  %v3408_v15 = vpack.c.bf16 %v2890_v14, %v2889_v12  ;;  %v3411_v20 = vpack.c.bf16 %v2892_v18, %v2891_v16  ;;  %v3643_v12 = vld [vmem:[%s4992_s4 + $0x60] ss:$8 sps:$4 sm:$0xff]   ;;  %v1243_v14 = vld [vmem:[%s4992_s4 + $0x70] sm:$0xff] }
 0x132   :  { %864 = vmatmul.mubr.f32.gmra.mrb[16].mxu1 %v4229_v21  ;;  %v2922_v16 = vcombine.low %v1243_v14, %v1243_v14 }
 0x133   :  { %3376 = vmatpush1.bf16.msra.mxu1 %v3375_v27  ;;  %2860 = vmatprep.mubr.msk.f32.mxu1 %vm770_vm8, %v4243_v32 }
 0x134   :  { %3377 = vmatprep.subr.bf16.mxu1 %v3789_v58  ;;  %v1324_v18 = vsel %vm71_vm4, %v2922_v16, 0 }
 0x135   :  { %v719_v19 = vpop.f32.mrb[8].mxu0 }
 0x136   :  { %v4258_v26 = vadd.f32 %v719_v19, %v195_v33  ;;  %v721_v57 = vpop.f32.mrb[9].mxu0  ;;  %869 = vmatmul.mubr.f32.gmra.mrb[18].mxu1 %v4234_v28 }
 0x137   :  { %v4261_v61 = vadd.f32 %v721_v57, %v196_v34  ;;  %3379 = vmatpush1.bf16.msra.mxu1 %v3378_v53  ;;  %v723_v35 = vpop.f32.mrb[10].mxu0 }
 0x138   :  { %v4263_v37 = vadd.f32 %v723_v35, %v197_v54  ;;  %v725_v38 = vpop.f32.mrb[11].mxu0  ;;  %3380 = vmatprep.subr.bf16.mxu1 %v3789_v58 }
 0x139   :  { %v4272_v41 = vadd.f32 %v725_v38, %v198_v23  ;;  %2861 = vmatprep.mubr.msk.f32.mxu1 %vm770_vm8, %v4261_v61 }
 0x13a   :  { %874 = vmatmul.mubr.f32.gmra.mrb[20].mxu1 %v4258_v26 }
 0x13b   :  { %3382 = vmatpush1.bf16.msra.mxu1 %v3381_v36  ;;  %2862 = vmatprep.mubr.msk.f32.mxu1 %vm770_vm8, %v4272_v41 }
 0x13c   :  { %3383 = vmatprep.subr.bf16.mxu1 %v3789_v58 }
 0x13e   :  { %879 = vmatmul.mubr.f32.gmra.mrb[22].mxu1 %v4263_v37 }
 0x13f   :  { %3385 = vmatpush1.bf16.msra.mxu1 %v3384_v42  ;;  %2893 = vmatprep.mubr.msk.f32.mxu1 %vm770_vm8, %v4205_v63  ;;  %v2884_v63 = vld [vmem:[%s4990_s2 + $0x198] sm:$0xff] }
 0x140   :  { %3386 = vmatprep.subr.bf16.mxu1 %v3789_v58  ;;  %v3399_v0 = vpack.c.bf16 %v2884_v63, %v2883_v62  ;;  %v3633_v62 = vld [vmem:[%s4992_s4 + $0x24] ss:$8 sps:$4 sm:$0xff]   ;;  %v3631_v63 = vld [vmem:[%s4992_s4 + $0x20] ss:$8 sps:$4 sm:$0xff]  }
 0x143   :  { %3388 = vmatpush1.bf16.msra.mxu1 %v3387_v47 }
 0x144   :  { %3389 = vmatprep.subr.bf16.mxu1 %v3789_v58 }
 0x147   :  { %3391 = vmatpush1.bf16.msra.mxu1 %v3390_v51  ;;  %v1017_v51 = vld [vmem:[%s4991_s3 + $0x8] sm:$0xff] }
 0x148   :  { %3392 = vmatprep.subr.bf16.mxu1 %v3789_v58 }
 0x14b   :  { %3394 = vmatpush1.bf16.msra.mxu1 %v3393_v59  ;;  %v2903_v59 = vld [vmem:[%s4991_s3 + $0x20] sm:$0xff] }
 0x14c   :  { %3395 = vmatprep.subr.bf16.mxu1 %v3789_v58 }
 0x14f   :  { %3397 = vmatpush1.bf16.msra.mxu1 %v3396_v60  ;;  %v3628_v60 = vld [vmem:[%s4992_s4 + $0x10] ss:$8 sps:$4 sm:$0xff]  }
 0x150   :  { %3398 = vmatprep.subr.bf16.mxu1 %v3789_v58 }
 0x153   :  { %3400 = vmatpush1.bf16.msra.mxu1 %v3399_v0  ;;  %v3636_v0 = vld [vmem:[%s4992_s4 + $0x34] ss:$8 sps:$4 sm:$0xff]  }
 0x154   :  { %3401 = vmatprep.subr.bf16.mxu1 %v3789_v58 }
 0x157   :  { %3403 = vmatpush1.bf16.msra.mxu1 %v3402_v8  ;;  %v3637_v8 = vld [vmem:[%s4992_s4 + $0x40] ss:$8 sps:$4 sm:$0xff]  }
 0x158   :  { %3404 = vmatprep.subr.bf16.mxu1 %v3789_v58 }
 0x15b   :  { %3406 = vmatpush1.bf16.msra.mxu1 %v3405_v11  ;;  %v3645_v11 = vld [vmem:[%s4992_s4 + $0x64] ss:$8 sps:$4 sm:$0xff]  }
 0x15c   :  { %3407 = vmatprep.subr.bf16.mxu1 %v3789_v58 }
 0x15f   :  { %3409 = vmatpush1.bf16.msra.mxu1 %v3408_v15  ;;  %v2923_v15 = vcombine.high %v1243_v14, %v1243_v14  ;;  %v1999_v14 = vld [vmem:[%s4993_s5 + $0x18] sm:$0xff] }
 0x160   :  { %3410 = vmatprep.subr.bf16.mxu1 %v3789_v58 }
 0x163   :  { %3412 = vmatpush1.bf16.msra.mxu1 %v3411_v20  ;;  %v3650_v20 = vld [vmem:[%s4992_s4 + $0x7c] ss:$8 sps:$4 sm:$0xff]  }
 0x166   :  { %980 = vmatmul.mubr.f32.vlgmr.msra.gmra.mrb[24].mxu1 %v4203_v7  ;;  %v3791_v7 = vmov 0.0  }
 0x167   :  { %2894 = vmatprep.mubr.msk.f32.mxu1 %vm770_vm8, %v4215_v9  ;;  %3211 = vmatprep.mubr.msk.f32.mxu0 %vm3790_vm9, %v3791_v7  ;;  %v3627_v9 = vld [vmem:[%s4992_s4 + $0x4] ss:$8 sps:$4 sm:$0xff]  }
 0x168   :  { %1329 = vmatprep.subr.bf16.mxu1 %v3627_v9 }
 0x16a   :  { %985 = vmatmul.mubr.f32.gmra.mrb[26].mxu1 %v4207_v3  ;;  %v3625_v3 = vld [vmem:[%s4992_s4] ss:$8 sps:$4 sm:$0xff]  }
 0x16b   :  { %2895 = vmatprep.mubr.msk.f32.mxu1 %vm770_vm8, %v4232_v24  ;;  %1330 = vmatpush1.bf16.msra.mxu1 %v3625_v3 }
 0x16c   :  { %1331 = vmatprep.subr.bf16.mxu1 %v3630_v6 }
 0x16e   :  { %990 = vmatmul.mubr.f32.gmra.mrb[28].mxu1 %v4229_v21 }
 0x16f   :  { %2896 = vmatprep.mubr.msk.f32.mxu1 %vm770_vm8, %v4243_v32  ;;  %1332 = vmatpush1.bf16.msra.mxu1 %v3628_v60 }
 0x170   :  { %1333 = vmatprep.subr.bf16.mxu1 %v3633_v62  ;;  %v3653_v62 = vld [vmem:[%s4992_s4 + $0x8c] ss:$8 sps:$4 sm:$0xff]  }
 0x172   :  { %995 = vmatmul.mubr.f32.gmra.mrb[30].mxu1 %v4234_v28 }
 0x173   :  { %2897 = vmatprep.mubr.msk.f32.mxu1 %vm770_vm8, %v4261_v61  ;;  %1334 = vmatpush1.bf16.msra.mxu1 %v3631_v63 }
 0x174   :  { %1335 = vmatprep.subr.bf16.mxu1 %v3636_v0 }
 0x176   :  { %1000 = vmatmul.mubr.f32.gmra.mrb[32].mxu1 %v4258_v26 }
 0x177   :  { %2898 = vmatprep.mubr.msk.f32.mxu1 %vm770_vm8, %v4272_v41  ;;  %1336 = vmatpush1.bf16.msra.mxu1 %v3634_v1 }
 0x178   :  { %1337 = vmatprep.subr.bf16.mxu1 %v3639_v4 }
 0x17a   :  { %1005 = vmatmul.mubr.f32.gmra.mrb[34].mxu1 %v4263_v37 }
 0x17b   :  { %1361 = vmatprep.mubr.bf16.mxu1 %v3788_v2  ;;  %1338 = vmatpush1.bf16.msra.mxu1 %v3637_v8  ;;  %v1996_v8 = vld [vmem:[%s4993_s5] sm:$0xff] }
 0x17c   :  { %1339 = vmatprep.subr.bf16.mxu1 %v3642_v13  ;;  %v1997_v13 = vld [vmem:[%s4993_s5 + $0x8] sm:$0xff] }
 0x17f   :  { %1340 = vmatpush1.bf16.msra.mxu1 %v3640_v10  ;;  %v1998_v10 = vld [vmem:[%s4993_s5 + $0x10] sm:$0xff] }
 0x180   :  { %1341 = vmatprep.subr.bf16.mxu1 %v3645_v11  ;;  %v3651_v11 = vld [vmem:[%s4992_s4 + $0x88] ss:$8 sps:$4 sm:$0xff]   ;;  %v3435_v16 = vpack.c.bf16 %v1999_v14, %v1998_v10  ;;  %v3691_v14 = vld [vmem:[%s4992_s4 + $0x154] ss:$8 sps:$4 sm:$0xff]  }
 0x181   :  { %v3683_v10 = vld [vmem:[%s4992_s4 + $0x130] ss:$8 sps:$4 sm:$0xff]  }
 0x183   :  { %1342 = vmatpush1.bf16.msra.mxu1 %v3643_v12  ;;  %v3432_v12 = vpack.c.bf16 %v1997_v13, %v1996_v8  ;;  %v3679_v8 = vld [vmem:[%s4992_s4 + $0x114] ss:$8 sps:$4 sm:$0xff]  }
 0x184   :  { %2924 = vmatprep.subr.msk.bf16.mxu1 %vm71_vm4, %v2923_v15  ;;  %v3656_v15 = vld [vmem:[%s4992_s4 + $0x9c] ss:$8 sps:$4 sm:$0xff]  }
 0x185   :  { %v3685_v13 = vld [vmem:[%s4992_s4 + $0x134] ss:$8 sps:$4 sm:$0xff]  }
 0x187   :  { %1344 = vmatpush1.bf16.msra.mxu1 %v1324_v18  ;;  %v2000_v18 = vld [vmem:[%s4993_s5 + $0x20] sm:$0xff] }
 0x188   :  { %1486 = vmatprep.subr.bf16.mxu1 %v3650_v20  ;;  %v2001_v20 = vld [vmem:[%s4993_s5 + $0x28] sm:$0xff] }
 0x1fd   :  { %v855_v21 = vpop.f32.mrb[12].mxu1 }
 0x1fe   :  { %v857_v22 = vpop.f32.mrb[13].mxu1 }
 0x201   :  { %v860_v24 = vpop.f32.mrb[14].mxu1 }
 0x202   :  { %v862_v25 = vpop.f32.mrb[15].mxu1 }
 0x205   :  { %v865_v27 = vpop.f32.mrb[16].mxu1 }
 0x206   :  { %v867_v28 = vpop.f32.mrb[17].mxu1 }
 0x209   :  { %v870_v29 = vpop.f32.mrb[18].mxu1 }
 0x20a   :  { %v872_v30 = vpop.f32.mrb[19].mxu1 }
 0x20d   :  { %v875_v31 = vpop.f32.mrb[20].mxu1 }
 0x20e   :  { %v877_v32 = vpop.f32.mrb[21].mxu1 }
 0x211   :  { %v880_v33 = vpop.f32.mrb[22].mxu1 }
 0x212   :  { %v882_v34 = vpop.f32.mrb[23].mxu1 }
 0x239   :  { %v981_v53 = vpop.f32.mrb[24].mxu1 }
 0x23a   :  { %v1010_v54 = vmax.f32 %v855_v21, %v981_v53  ;;  %v983_v56 = vpop.f32.mrb[25].mxu1 }
 0x23d   :  { %v986_v17 = vpop.f32.mrb[26].mxu1 }
 0x23e   :  { %v1011_v19 = vmax.f32 %v860_v24, %v986_v17  ;;  %v988_v23 = vpop.f32.mrb[27].mxu1 }
 0x240   :  { %v3414_v26 = vpack.c.bf16 %v1011_v19, %v1010_v54 }
 0x241   :  { %v991_v57 = vpop.f32.mrb[28].mxu1 }
 0x242   :  { %v1012_v61 = vmax.f32 %v865_v27, %v991_v57  ;;  %v993_v35 = vpop.f32.mrb[29].mxu1  ;;  %3415 = vmatpush3.bf16.msra.mxu0 %v3414_v26 }
 0x243   :  { %3416 = vmatprep.subr.bf16.mxu0 %v3789_v58 }
 0x245   :  { %v996_v36 = vpop.f32.mrb[30].mxu1 }
 0x246   :  { %v1013_v37 = vmax.f32 %v870_v29, %v996_v36  ;;  %v998_v38 = vpop.f32.mrb[31].mxu1 }
 0x248   :  { %v3417_v39 = vpack.c.bf16 %v1013_v37, %v1012_v61 }
 0x249   :  { %v1001_v40 = vpop.f32.mrb[32].mxu1 }
 0x24a   :  { %v1014_v41 = vmax.f32 %v875_v31, %v1001_v40  ;;  %v1003_v42 = vpop.f32.mrb[33].mxu1  ;;  %3418 = vmatpush3.bf16.msra.mxu0 %v3417_v39 }
 0x24b   :  { %3419 = vmatprep.subr.bf16.mxu0 %v3789_v58 }
 0x24d   :  { %v1006_v43 = vpop.f32.mrb[34].mxu1 }
 0x24e   :  { %v1015_v44 = vmax.f32 %v880_v33, %v1006_v43  ;;  %v1008_v47 = vpop.f32.mrb[35].mxu1 }
 0x250   :  { %v3420_v49 = vpack.c.bf16 %v1015_v44, %v1014_v41 }
 0x252   :  { %3421 = vmatpush3.bf16.msra.mxu0 %v3420_v49 }
 0x253   :  { %3422 = vmatprep.subr.bf16.mxu0 %v3789_v58 }
 0x255   :  { %3212 = vmatmul.mubr.msk.f32.vlgmr.msra.gmra.mrb[12].mxu0 %vm1019_vm10, %v1016_v50 }
 0x256   :  { %3424 = vmatpush3.bf16.msra.mxu0 %v3414_v26  ;;  %3214 = vmatprep.mubr.msk.f32.mxu0 %vm3790_vm9, %v3791_v7 }
 0x257   :  { %3425 = vmatprep.subr.bf16.mxu0 %v3789_v58 }
 0x259   :  { %3215 = vmatmul.mubr.msk.f32.gmra.mrb[14].mxu0 %vm1019_vm10, %v1017_v51 }
 0x25a   :  { %3427 = vmatpush3.bf16.msra.mxu0 %v3417_v39  ;;  %3217 = vmatprep.mubr.msk.f32.mxu0 %vm3790_vm9, %v3791_v7 }
 0x25b   :  { %3428 = vmatprep.subr.bf16.mxu0 %v3789_v58 }
 0x25d   :  { %3218 = vmatmul.mubr.msk.f32.gmra.mrb[16].mxu0 %vm1019_vm10, %v1018_v52 }
 0x25e   :  { %3430 = vmatpush3.bf16.msra.mxu0 %v3420_v49  ;;  %3232 = vmatprep.mubr.msk.f32.mxu0 %vm3790_vm9, %v3791_v7 }
 0x25f   :  { %3431 = vmatprep.subr.bf16.mxu0 %v3789_v58 }
 0x261   :  { %3233 = vmatmul.mubr.msk.f32.vlgmr.msra.gmra.mrb[18].mxu0 %vm1019_vm10, %v2902_v55  ;;  %v3648_v55 = vld [vmem:[%s4992_s4 + $0x78] ss:$8 sps:$4 sm:$0xff]  }
 0x262   :  { %3235 = vmatprep.mubr.msk.f32.mxu0 %vm3790_vm9, %v3791_v7  ;;  %3433 = vmatpush1.bf16.msra.mxu0 %v3432_v12  ;;  %v3686_v12 = vld [vmem:[%s4992_s4 + $0x140] ss:$8 sps:$4 sm:$0xff]  }
 0x263   :  { %3434 = vmatprep.subr.bf16.mxu0 %v3789_v58 }
 0x265   :  { %3236 = vmatmul.mubr.msk.f32.gmra.mrb[20].mxu0 %vm1019_vm10, %v2903_v59 }
 0x266   :  { %3238 = vmatprep.mubr.msk.f32.mxu0 %vm3790_vm9, %v3791_v7  ;;  %3436 = vmatpush1.bf16.msra.mxu0 %v3435_v16  ;;  %v3689_v16 = vld [vmem:[%s4992_s4 + $0x150] ss:$8 sps:$4 sm:$0xff]  }
 0x267   :  { %3437 = vmatprep.subr.bf16.mxu0 %v3789_v58 }
 0x269   :  { %3239 = vmatmul.mubr.msk.f32.gmra.mrb[22].mxu0 %vm1019_vm10, %v2904_v5 }
 0x328   :  { %v1095_v3 = vpop.f32.mrb[12].mxu0 }
 0x329   :  { %v3213_v9 = vpop.f32.mrb[13].mxu0 }
 0x32a   :  { %v3659_v9 = vld [vmem:[%s4992_s4 + $0xac] ss:$8 sps:$4 sm:$0xff]  }
 0x32c   :  { %v1100_v21 = vpop.f32.mrb[14].mxu0 }
 0x32d   :  { %v3216_v22 = vpop.f32.mrb[15].mxu0 }
 0x32e   :  { %v2002_v22 = vld [vmem:[%s4993_s5 + $0x30] sm:$0xff] }
 0x330   :  { %v1105_v24 = vpop.f32.mrb[16].mxu0 }
 0x331   :  { %v3219_v25 = vpop.f32.mrb[17].mxu0 }
 0x332   :  { %v3657_v25 = vld [vmem:[%s4992_s4 + $0xa8] ss:$8 sps:$4 sm:$0xff]  }
 0x334   :  { %v1188_v27 = vpop.f32.mrb[18].mxu0 }
 0x335   :  { %v1202_v28 = vmax.f32 %v1095_v3, %v1188_v27  ;;  %v3234_v29 = vpop.f32.mrb[19].mxu0  ;;  %v3654_v3 = vld [vmem:[%s4992_s4 + $0x98] ss:$8 sps:$4 sm:$0xff]   ;;  %v3662_v27 = vld [vmem:[%s4992_s4 + $0xbc] ss:$8 sps:$4 sm:$0xff]  }
 0x336   :  { %v2004_v29 = vld [vmem:[%s4993_s5 + $0x40] sm:$0xff] }
 0x337   :  { %v1205_v31 = vmax.f32 %v1202_v28, 0.0 }
 0x338   :  { %v1193_v30 = vpop.f32.mrb[20].mxu0 }
 0x339   :  { %v3237_v32 = vpop.f32.mrb[21].mxu0  ;;  %v1203_v33 = vmax.f32 %v1100_v21, %v1193_v30  ;;  %v1377_v54 = vrot.slane %v1205_v31, 1  ;;  %v1533_v56 = vrot.slane %v1205_v31, 2  ;;  %v1689_v23 = vrot.slane %v1205_v31, 3  ;;  %v2005_v30 = vld [vmem:[%s4993_s5 + $0x48] sm:$0xff] }
 0x33a   :  { %v1845_v35 = vrot.slane %v1205_v31, 4  ;;  %v3438_v21 = vpack.c.bf16 %v2001_v20, %v2000_v18  ;;  %v3665_v32 = vld [vmem:[%s4992_s4 + $0xcc] ss:$8 sps:$4 sm:$0xff]  }
 0x33b   :  { %v1206_v34 = vmax.f32 %v1203_v33, 0.0  ;;  %v3444_v33 = vpack.c.bf16 %v2005_v30, %v2004_v29  ;;  %v3711_v29 = vld [vmem:[%s4992_s4 + $0x1bc] ss:$8 sps:$4 sm:$0xff]   ;;  %v3709_v30 = vld [vmem:[%s4992_s4 + $0x1b8] ss:$8 sps:$4 sm:$0xff]  }
 0x33c   :  { %v1198_v53 = vpop.f32.mrb[22].mxu0  ;;  %3439 = vmatpush1.bf16.msra.mxu0 %v3438_v21  ;;  %v3694_v21 = vld [vmem:[%s4992_s4 + $0x168] ss:$8 sps:$4 sm:$0xff]  }
 0x33d   :  { %v1204_v17 = vmax.f32 %v1105_v24, %v1198_v53  ;;  %v3240_v19 = vpop.f32.mrb[23].mxu0  ;;  %v1224_v26 = vrot.slane %v1206_v34, 4  ;;  %v1378_v57 = vrot.slane %v1206_v34, 1  ;;  %v1534_v61 = vrot.slane %v1206_v34, 2  ;;  %v2003_v24 = vld [vmem:[%s4993_s5 + $0x38] sm:$0xff]  ;;  %3440 = vmatprep.subr.bf16.mxu0 %v3789_v58 }
 0x33e   :  { %v1381_v37 = vrot.slane %v1206_v34, 5  ;;  %v1690_v38 = vrot.slane %v1206_v34, 3  ;;  %v1537_v41 = vrot.slane %v1206_v34, 6  ;;  %v1693_v42 = vrot.slane %v1206_v34, 7  ;;  %v2006_v34 = vld [vmem:[%s4993_s5 + $0x50] sm:$0xff]  ;;  %v2007_v53 = vld [vmem:[%s4993_s5 + $0x58] sm:$0xff] }
 0x33f   :  { %v4455_v36 = vmax.f32 %v1204_v17, 0.0  ;;  %v4458_v39 = vsel %vm202_vm1, %v1377_v54, %v1378_v57  ;;  %v4461_v40 = vsel %vm117_vm0, %v1533_v56, %v1534_v61  ;;  %v4471_v51 = vsel %vm71_vm4, %v1845_v35, %v1224_v26  ;;  %v3663_v54 = vld [vmem:[%s4992_s4 + $0xc8] ss:$8 sps:$4 sm:$0xff]   ;;  %v3668_v56 = vld [vmem:[%s4992_s4 + $0xdc] ss:$8 sps:$4 sm:$0xff]  }
 0x340   :  { %v4468_v50 = vsel %vm477_vm6, %v1689_v23, %v1690_v38  ;;  %v3441_v28 = vpack.c.bf16 %v2003_v24, %v2002_v22  ;;  %v2940_v17 = vld [vmem:[%s4992_s4 + $0xe8] sm:$0xff]  ;;  %v3447_v19 = vpack.c.bf16 %v2007_v53, %v2006_v34  ;;  %v2008_v23 = vld [vmem:[%s4993_s5 + $0x60] sm:$0xff]  ;;  %v2010_v38 = vld [vmem:[%s4993_s5 + $0x70] sm:$0xff]  ;;  %vm2785_vm0 = vcmask 74752  }
 0x341   :  { %v1225_v43 = vrot.slane %v4455_v36, 4  ;;  %v1382_v44 = vrot.slane %v4455_v36, 5  ;;  %v1538_v47 = vrot.slane %v4455_v36, 6  ;;  %v1694_v49 = vrot.slane %v4455_v36, 7  ;;  %v3666_v57 = vld [vmem:[%s4992_s4 + $0xd8] ss:$8 sps:$4 sm:$0xff]  }
 0x342   :  { %v1848_v4 = vpack.c.bf16 %v4455_v36, %v4471_v51  ;;  %3442 = vmatpush1.bf16.msra.mxu0 %v3441_v28  ;;  %v2956_v61 = vcombine.high %v2940_v17, %v2940_v17  ;;  %v2955_v35 = vcombine.low %v2940_v17, %v2940_v17  ;;  %v3699_v22 = vld [vmem:[%s4992_s4 + $0x17c] ss:$8 sps:$4 sm:$0xff]   ;;  %v3697_v24 = vld [vmem:[%s4992_s4 + $0x178] ss:$8 sps:$4 sm:$0xff]   ;;  %v3706_v28 = vld [vmem:[%s4992_s4 + $0x1a8] ss:$8 sps:$4 sm:$0xff]  }
 0x343   :  { %v1226_v52 = vsel %vm71_vm4, %v1224_v26, %v1225_v43  ;;  %v4478_v59 = vsel %vm213_vm3, %v1381_v37, %v1382_v44  ;;  %v4481_v5 = vsel %vm350_vm5, %v1537_v41, %v1538_v47  ;;  %v4484_v6 = vsel %vm488_vm7, %v1693_v42, %v1694_v49  ;;  %3443 = vmatprep.subr.bf16.mxu0 %v3789_v58  ;;  %v2009_v26 = vld [vmem:[%s4993_s5 + $0x68] sm:$0xff]  ;;  %v2011_v41 = vld [vmem:[%s4993_s5 + $0x78] sm:$0xff]  ;;  %v2012_v47 = vld [vmem:[%s4993_s5 + $0x80] sm:$0xff] }
 0x344   :  { %v1228_v60 = vpack.c.bf16 %v1226_v52, %v1205_v31  ;;  %v1385_v63 = vpack.c.bf16 %v4478_v59, %v4458_v39  ;;  %v1541_v0 = vpack.c.bf16 %v4481_v5, %v4461_v40  ;;  %v1697_v1 = vpack.c.bf16 %v4484_v6, %v4468_v50  ;;  %v3660_v31 = vld [vmem:[%s4992_s4 + $0xb8] ss:$8 sps:$4 sm:$0xff]   ;;  %v3673_v43 = vld [vmem:[%s4992_s4 + $0xf4] ss:$8 sps:$4 sm:$0xff]   ;;  %v2013_v49 = vld [vmem:[%s4993_s5 + $0x88] sm:$0xff] }
 0x345   :  { %v3450_v37 = vpack.c.bf16 %v2009_v26, %v2008_v23  ;;  %v1481_v42 = vsel %vm71_vm4, %v2955_v35, 0  ;;  %v3453_v44 = vpack.c.bf16 %v2011_v41, %v2010_v38  ;;  %v3671_v52 = vld [vmem:[%s4992_s4 + $0xf0] ss:$8 sps:$4 sm:$0xff]   ;;  %v3682_v59 = vld [vmem:[%s4992_s4 + $0x124] ss:$8 sps:$4 sm:$0xff]  }
 0x346   :  { %2925 = vmatmul.mubr.msk.bf16.vlgmr.msra.gmra.mrb[36].mxu1 %vm1319_vm11, %v1228_v60  ;;  %3445 = vmatpush1.bf16.msra.mxu0 %v3444_v33  ;;  %v3456_v60 = vpack.c.bf16 %v2013_v49, %v2012_v47  ;;  %v3677_v39 = vld [vmem:[%s4992_s4 + $0x110] ss:$8 sps:$4 sm:$0xff]   ;;  %v3705_v40 = vld [vmem:[%s4992_s4 + $0x19c] ss:$8 sps:$4 sm:$0xff]   ;;  %v3717_v17 = vld [vmem:[%s4992_s4 + $0x1e0] ss:$8 sps:$4 sm:$0xff]  }
 0x347   :  { %1487 = vmatpush1.bf16.msra.mxu1 %v3648_v55  ;;  %1518 = vmatprep.mubr.bf16.mxu1 %v3788_v2  ;;  %v3676_v55 = vld [vmem:[%s4992_s4 + $0x104] ss:$8 sps:$4 sm:$0xff]   ;;  %v3703_v5 = vld [vmem:[%s4992_s4 + $0x198] ss:$8 sps:$4 sm:$0xff]   ;;  %v3712_v33 = vld [vmem:[%s4992_s4 + $0x1c8] ss:$8 sps:$4 sm:$0xff]  }
 0x348   :  { %1488 = vmatprep.subr.bf16.mxu1 %v3653_v62  ;;  %3446 = vmatprep.subr.bf16.mxu0 %v3789_v58  ;;  %v3674_v62 = vld [vmem:[%s4992_s4 + $0x100] ss:$8 sps:$4 sm:$0xff]   ;;  %v3720_v23 = vld [vmem:[%s4992_s4 + $0x1f0] ss:$8 sps:$4 sm:$0xff]   ;;  %v3725_v26 = vld [vmem:[%s4992_s4 + $0x204] ss:$8 sps:$4 sm:$0xff]  }
 0x349   :  { %v3728_v50 = vld [vmem:[%s4992_s4 + $0x214] ss:$8 sps:$4 sm:$0xff]   ;;  %v3731_v6 = vld [vmem:[%s4992_s4 + $0x224] ss:$8 sps:$4 sm:$0xff]   ;;  %v3732_v35 = vld [vmem:[%s4992_s4 + $0x230] ss:$8 sps:$4 sm:$0xff]  }
 0x34a   :  { %3448 = vmatpush1.bf16.msra.mxu0 %v3447_v19  ;;  %v3722_v19 = vld [vmem:[%s4992_s4 + $0x1f4] ss:$8 sps:$4 sm:$0xff]   ;;  %v3735_v41 = vld [vmem:[%s4992_s4 + $0x240] ss:$8 sps:$4 sm:$0xff]  }
 0x34b   :  { %1489 = vmatpush1.bf16.msra.mxu1 %v3651_v11  ;;  %3449 = vmatprep.subr.bf16.mxu0 %v3789_v58  ;;  %v3688_v11 = vld [vmem:[%s4992_s4 + $0x144] ss:$8 sps:$4 sm:$0xff]   ;;  %v3039_v38 = vld [vmem:[%s4992_s4 + $0x250] sm:$0xff]  ;;  %v2015_v49 = vld [vmem:[%s4993_s5 + $0x98] sm:$0xff] }
 0x34c   :  { %1490 = vmatprep.subr.bf16.mxu1 %v3656_v15  ;;  %v2973_v15 = vld [vmem:[%s4992_s4 + $0x160] sm:$0xff]  ;;  %v2014_v47 = vld [vmem:[%s4993_s5 + $0x90] sm:$0xff] }
 0x34d   :  { %v2989_v18 = vcombine.high %v2973_v15, %v2973_v15  ;;  %v2988_v20 = vcombine.low %v2973_v15, %v2973_v15  ;;  %v1208_v36 = vld [vmem:[%s4998_s10] sm:$0x3]  ;;  %v3065_v15 = vld [vmem:[%s4993_s5 + $0xc8] sm:$0xff] }
 0x34e   :  { %3451 = vmatpush1.bf16.msra.mxu0 %v3450_v37  ;;  %v3737_v37 = vld [vmem:[%s4992_s4 + $0x244] ss:$8 sps:$4 sm:$0xff]   ;;  %v1217_v51 = vrot.slane %v1208_v36, %v61_v48 }
 0x34f   :  { %1491 = vmatpush1.bf16.msra.mxu1 %v3654_v3  ;;  %3452 = vmatprep.subr.bf16.mxu0 %v3789_v58  ;;  %v1637_v3 = vsel %vm71_vm4, %v2988_v20, 0  ;;  %v3067_v20 = vld [vmem:[%s4993_s5 + $0xd8] sm:$0xff] }
 0x350   :  { %1492 = vmatprep.subr.bf16.mxu1 %v3659_v9  ;;  %v3696_v9 = vld [vmem:[%s4992_s4 + $0x16c] ss:$8 sps:$4 sm:$0xff]  }
 0x352   :  { %3454 = vmatpush1.bf16.msra.mxu0 %v3453_v44 }
 0x353   :  { %1493 = vmatpush1.bf16.msra.mxu1 %v3657_v25  ;;  %3455 = vmatprep.subr.bf16.mxu0 %v3789_v58  ;;  %v3702_v25 = vld [vmem:[%s4992_s4 + $0x18c] ss:$8 sps:$4 sm:$0xff]  }
 0x354   :  { %1494 = vmatprep.subr.bf16.mxu1 %v3662_v27  ;;  %v3700_v27 = vld [vmem:[%s4992_s4 + $0x188] ss:$8 sps:$4 sm:$0xff]  }
 0x356   :  { %3457 = vmatpush1.bf16.msra.mxu0 %v3456_v60  ;;  %v3061_v60 = vld [vmem:[%s4993_s5 + $0xa8] sm:$0xff] }
 0x357   :  { %1495 = vmatpush1.bf16.msra.mxu1 %v3660_v31  ;;  %3458 = vmatprep.subr.bf16.mxu0 %v3789_v58  ;;  %v3714_v31 = vld [vmem:[%s4992_s4 + $0x1cc] ss:$8 sps:$4 sm:$0xff]  }
 0x358   :  { %1496 = vmatprep.subr.bf16.mxu1 %v3665_v32  ;;  %v3006_v32 = vld [vmem:[%s4992_s4 + $0x1d8] sm:$0xff] }
 0x359   :  { %v3022_v34 = vcombine.high %v3006_v32, %v3006_v32  ;;  %v3021_v53 = vcombine.low %v3006_v32, %v3006_v32  ;;  %v3077_v32 = vld [vmem:[%s4993_s5 + $0x128] sm:$0xff] }
 0x35b   :  { %1497 = vmatpush1.bf16.msra.mxu1 %v3663_v54  ;;  %v1793_v54 = vsel %vm71_vm4, %v3021_v53, 0  ;;  %v3079_v53 = vld [vmem:[%s4993_s5 + $0x138] sm:$0xff] }
 0x35c   :  { %1498 = vmatprep.subr.bf16.mxu1 %v3668_v56  ;;  %v3719_v56 = vld [vmem:[%s4992_s4 + $0x1e4] ss:$8 sps:$4 sm:$0xff]  }
 0x35f   :  { %1499 = vmatpush1.bf16.msra.mxu1 %v3666_v57  ;;  %v3723_v57 = vld [vmem:[%s4992_s4 + $0x200] ss:$8 sps:$4 sm:$0xff]  }
 0x360   :  { %2957 = vmatprep.subr.msk.bf16.mxu1 %vm71_vm4, %v2956_v61  ;;  %v3734_v61 = vld [vmem:[%s4992_s4 + $0x234] ss:$8 sps:$4 sm:$0xff]  }
 0x363   :  { %1501 = vmatpush1.bf16.msra.mxu1 %v1481_v42  ;;  %v3055_v42 = vcombine.high %v3039_v38, %v3039_v38 }
 0x364   :  { %1642 = vmatprep.subr.bf16.mxu1 %v3673_v43  ;;  %v3054_v43 = vcombine.low %v3039_v38, %v3039_v38  ;;  %v3740_v38 = vld [vmem:[%s4995_s7] sm:$0xff]  }
 0x366   :  { %2958 = vmatmul.mubr.msk.bf16.vlgmr.msra.gmra.mrb[36].mxu1 %vm1319_vm11, %v1385_v63  ;;  %v3680_v63 = vld [vmem:[%s4992_s4 + $0x120] ss:$8 sps:$4 sm:$0xff]   ;;  %v1944_v44 = vsel %vm71_vm4, %v3054_v43, 0 }
 0x367   :  { %1643 = vmatpush1.bf16.msra.mxu1 %v3671_v52  ;;  %1674 = vmatprep.mubr.bf16.mxu1 %v3788_v2  ;;  %v3459_v52 = vpack.c.bf16 %v2015_v49, %v2014_v47  ;;  %v3744_v43 = vld [vmem:[%s4995_s7 + $0x20] sm:$0xff]   ;;  %v3761_v47 = vld [vmem:[%s4996_s8 + $0x8] sm:$0xff]  }
 0x368   :  { %1644 = vmatprep.subr.bf16.mxu1 %v3676_v55  ;;  %v3060_v55 = vld [vmem:[%s4993_s5 + $0xa0] sm:$0xff] }
 0x369   :  { %3460 = vmatpush1.bf16.msra.mxu0 %v3459_v52 }
 0x36a   :  { %3461 = vmatprep.subr.bf16.mxu0 %v3789_v58 }
 0x36b   :  { %1645 = vmatpush1.bf16.msra.mxu1 %v3674_v62 }
 0x36c   :  { %1646 = vmatprep.subr.bf16.mxu1 %v3679_v8 }
 0x36f   :  { %1647 = vmatpush1.bf16.msra.mxu1 %v3677_v39 }
 0x370   :  { %1648 = vmatprep.subr.bf16.mxu1 %v3682_v59 }
 0x373   :  { %1649 = vmatpush1.bf16.msra.mxu1 %v3680_v63  ;;  %v3462_v63 = vpack.c.bf16 %v3061_v60, %v3060_v55  ;;  %v3745_v60 = vld [vmem:[%s4995_s7 + $0x28] sm:$0xff]  }
 0x374   :  { %1650 = vmatprep.subr.bf16.mxu1 %v3685_v13 }
 0x377   :  { %1651 = vmatpush1.bf16.msra.mxu1 %v3683_v10 }
 0x378   :  { %1652 = vmatprep.subr.bf16.mxu1 %v3688_v11 }
 0x37b   :  { %1653 = vmatpush1.bf16.msra.mxu1 %v3686_v12 }
 0x37c   :  { %1654 = vmatprep.subr.bf16.mxu1 %v3691_v14  ;;  %v3064_v14 = vld [vmem:[%s4993_s5 + $0xc0] sm:$0xff] }
 0x37f   :  { %1655 = vmatpush1.bf16.msra.mxu1 %v3689_v16  ;;  %v3468_v16 = vpack.c.bf16 %v3065_v15, %v3064_v14  ;;  %v3756_v15 = vld [vmem:[%s4995_s7 + $0x80] sm:$0xff]  }
 0x380   :  { %2990 = vmatprep.subr.msk.bf16.mxu1 %vm71_vm4, %v2989_v18  ;;  %v3066_v18 = vld [vmem:[%s4993_s5 + $0xd0] sm:$0xff] }
 0x383   :  { %1657 = vmatpush1.bf16.msra.mxu1 %v1637_v3  ;;  %v3471_v3 = vpack.c.bf16 %v3067_v20, %v3066_v18  ;;  %v3758_v18 = vld [vmem:[%s4995_s7 + $0x90] sm:$0xff]   ;;  %v3759_v20 = vld [vmem:[%s4995_s7 + $0x98] sm:$0xff]  }
 0x384   :  { %1798 = vmatprep.subr.bf16.mxu1 %v3696_v9  ;;  %v3068_v9 = vld [vmem:[%s4993_s5 + $0xe0] sm:$0xff] }
 0x386   :  { %2991 = vmatmul.mubr.msk.bf16.vlgmr.msra.gmra.mrb[36].mxu1 %vm1319_vm11, %v1541_v0  ;;  %v3708_v0 = vld [vmem:[%s4992_s4 + $0x1ac] ss:$8 sps:$4 sm:$0xff]  }
 0x387   :  { %1799 = vmatpush1.bf16.msra.mxu1 %v3694_v21  ;;  %1830 = vmatprep.mubr.bf16.mxu1 %v3788_v2  ;;  %v3069_v21 = vld [vmem:[%s4993_s5 + $0xe8] sm:$0xff] }
 0x388   :  { %1800 = vmatprep.subr.bf16.mxu1 %v3699_v22  ;;  %v3474_v22 = vpack.c.bf16 %v3069_v21, %v3068_v9  ;;  %v3762_v9 = vld [vmem:[%s4996_s8 + $0x10] sm:$0xff]   ;;  %v3763_v21 = vld [vmem:[%s4996_s8 + $0x18] ss:$0 sps:$4 sm:$0x11]  }
 0x38b   :  { %1801 = vmatpush1.bf16.msra.mxu1 %v3697_v24  ;;  %v3070_v24 = vld [vmem:[%s4993_s5 + $0xf0] sm:$0xff] }
 0x38c   :  { %1802 = vmatprep.subr.bf16.mxu1 %v3702_v25  ;;  %v3071_v25 = vld [vmem:[%s4993_s5 + $0xf8] sm:$0xff] }
 0x38f   :  { %1803 = vmatpush1.bf16.msra.mxu1 %v3700_v27  ;;  %v3477_v27 = vpack.c.bf16 %v3071_v25, %v3070_v24  ;;  %v3085_v24 = vld [vmem:[%s4999_s11] ss:$0 sm:$0xff] }
 0x390   :  { %1804 = vmatprep.subr.bf16.mxu1 %v3705_v40  ;;  %v3072_v40 = vld [vmem:[%s4993_s5 + $0x100] sm:$0xff] }
 0x393   :  { %1805 = vmatpush1.bf16.msra.mxu1 %v3703_v5  ;;  %v3073_v5 = vld [vmem:[%s4993_s5 + $0x108] sm:$0xff] }
 0x394   :  { %1806 = vmatprep.subr.bf16.mxu1 %v3708_v0  ;;  %v3480_v0 = vpack.c.bf16 %v3073_v5, %v3072_v40 }
 0x397   :  { %1807 = vmatpush1.bf16.msra.mxu1 %v3706_v28  ;;  %v3074_v28 = vld [vmem:[%s4993_s5 + $0x110] sm:$0xff] }
 0x398   :  { %1808 = vmatprep.subr.bf16.mxu1 %v3711_v29  ;;  %v3075_v29 = vld [vmem:[%s4993_s5 + $0x118] sm:$0xff] }
 0x39b   :  { %1809 = vmatpush1.bf16.msra.mxu1 %v3709_v30  ;;  %v3483_v30 = vpack.c.bf16 %v3075_v29, %v3074_v28 }
 0x39c   :  { %1810 = vmatprep.subr.bf16.mxu1 %v3714_v31  ;;  %v3076_v31 = vld [vmem:[%s4993_s5 + $0x120] sm:$0xff] }
 0x39f   :  { %1811 = vmatpush1.bf16.msra.mxu1 %v3712_v33  ;;  %v3486_v33 = vpack.c.bf16 %v3077_v32, %v3076_v31 }
 0x3a0   :  { %3023 = vmatprep.subr.msk.bf16.mxu1 %vm71_vm4, %v3022_v34  ;;  %v3078_v34 = vld [vmem:[%s4993_s5 + $0x130] sm:$0xff] }
 0x3a3   :  { %1813 = vmatpush1.bf16.msra.mxu1 %v1793_v54  ;;  %v3489_v54 = vpack.c.bf16 %v3079_v53, %v3078_v34 }
 0x3a4   :  { %1949 = vmatprep.subr.bf16.mxu1 %v3719_v56 }
 0x3a6   :  { %3024 = vmatmul.mubr.msk.bf16.vlgmr.msra.gmra.mrb[36].mxu1 %vm1319_vm11, %v1697_v1  ;;  %v3729_v1 = vld [vmem:[%s4992_s4 + $0x220] ss:$8 sps:$4 sm:$0xff]  }
 0x3a7   :  { %1950 = vmatpush1.bf16.msra.mxu1 %v3717_v17  ;;  %1981 = vmatprep.mubr.bf16.mxu1 %v3788_v2  ;;  %v3726_v2 = vld [vmem:[%s4992_s4 + $0x210] ss:$8 sps:$4 sm:$0xff]  }
 0x3a8   :  { %1951 = vmatprep.subr.bf16.mxu1 %v3722_v19 }
 0x3ab   :  { %1952 = vmatpush1.bf16.msra.mxu1 %v3720_v23 }
 0x3ac   :  { %1953 = vmatprep.subr.bf16.mxu1 %v3725_v26 }
 0x3af   :  { %1954 = vmatpush1.bf16.msra.mxu1 %v3723_v57 }
 0x3b0   :  { %1955 = vmatprep.subr.bf16.mxu1 %v3728_v50 }
 0x3b3   :  { %1956 = vmatpush1.bf16.msra.mxu1 %v3726_v2 }
 0x3b4   :  { %1957 = vmatprep.subr.bf16.mxu1 %v3731_v6 }
 0x3b7   :  { %1958 = vmatpush1.bf16.msra.mxu1 %v3729_v1 }
 0x3b8   :  { %1959 = vmatprep.subr.bf16.mxu1 %v3734_v61 }
 0x3bb   :  { %1960 = vmatpush1.bf16.msra.mxu1 %v3732_v35  ;;  %v2196_v35 = vld [vmem:[%s4994_s6] sm:$0xff] }
 0x3bc   :  { %1961 = vmatprep.subr.bf16.mxu1 %v3737_v37  ;;  %v3083_v37 = vld [vmem:[%s4994_s6 + $0x8] sm:$0xff] }
 0x3bf   :  { %1962 = vmatpush1.bf16.msra.mxu1 %v3735_v41  ;;  %v3742_v41 = vld [vmem:[%s4995_s7 + $0x10] sm:$0xff]  }
 0x3c0   :  { %3056 = vmatprep.subr.msk.bf16.mxu1 %vm71_vm4, %v3055_v42  ;;  %v3743_v42 = vld [vmem:[%s4995_s7 + $0x18] sm:$0xff]  }
 0x3c3   :  { %1964 = vmatpush1.bf16.msra.mxu1 %v1944_v44  ;;  %v3760_v44 = vld [vmem:[%s4996_s8] sm:$0xff]   ;;  %s3792_s8 = smov [#allocation2]  }
 0x3c4   :  { %3311 = vmatprep.subr.bf16.mxu1 %v3791_v7  ;;  %s2793_s4 = sshll.u32 %s3792_s8, 4  ;;  %s2794_s4 = int_to_ptr.vmem [resolvable:$true] %s2793_s4 }
 0x3c5   :  { %s3764_s11 = scalar_lea.vmem %s2794_s4, 32  ;;  %p3769_p1 = scmp.lt.s32.totalorder %s2794_s4, %s2794_s4 }
 0x3c6   :  { %3057 = vmatmul.mubr.msk.bf16.vlgmr.msra.gmra.mrb[36].mxu1 %vm1319_vm11, %v1848_v4  ;;  %v1213_v4 = vrot.slane %v1208_v36, %v57_v46  ;;  %v3063_v46 = vld [vmem:[%s4993_s5 + $0xb8] sm:$0xff]  ;;  %p3765_p0 = scmp.ne.s32.totalorder %s2794_s4, %s3764_s11  ;;  %p3770_p2 = scmp.lt.s32.totalorder %s3764_s11, %s3764_s11 }
 0x3c7   :  { %3319 = vmatprep.mubr.msk.bf16.mxu1 %vm3790_vm9, %v3791_v7  ;;  %v3465_v11 = vpack.c.bf16 %v3063_v46, %v3062_v45  ;;  %3312 = vmatpush3.bf16.msra.mxu1 %v3760_v44  ;;  %v3751_v45 = vld [vmem:[%s4995_s7 + $0x58] sm:$0xff]   ;;  %v3752_v46 = vld [vmem:[%s4995_s7 + $0x60] sm:$0xff]  }
 0x3c8   :  { %3313 = vmatprep.subr.bf16.mxu1 %v3791_v7  ;;  %p3771_p3 = por %p3770_p2, %p3769_p1 }
 0x3ca   :  { %p3772_p4 = pnand %p3771_p3, %p3765_p0 }
 0x3cb   :  { %3314 = vmatpush3.bf16.msra.mxu1 %v3761_v47 }
 0x3cc   :  { %3315 = vmatprep.subr.bf16.mxu1 %v3791_v7 }
 0x3cf   :  { %3316 = vmatpush3.bf16.msra.mxu1 %v3762_v9 }
 0x3d0   :  { %3317 = vmatprep.subr.bf16.mxu1 %v3791_v7 }
 0x499   :  { %v1983_v62 = vpop.f32.mrb[36].mxu1 }
 0x49a   :  { %v1985_v8 = vpop.f32.mrb[37].mxu1  ;;  %v3521_v13 = vadd.f32 %v1983_v62, %v1213_v4 }
 0x49b   :  { %v3522_v39 = vadd.f32 %v1985_v8, %v1217_v51  ;;  %v1987_v59 = vpop.f32.mrb[38].mxu1  ;;  %v3746_v8 = vld [vmem:[%s4995_s7 + $0x30] sm:$0xff]  }
 0x49c   :  { %v1989_v10 = vpop.f32.mrb[39].mxu1  ;;  %v3523_v12 = vadd.f32 %v1987_v59, %v1213_v4  ;;  %v3748_v59 = vld [vmem:[%s4995_s7 + $0x40] sm:$0xff]  }
 0x49d   :  { %v3524_v48 = vadd.f32 %v1989_v10, %v1217_v51  ;;  %3058 = vmatprep.mubr.msk.f32.mxu0 %vm2016_vm12, %v3522_v39 }
 0x49e   :  { %2088 = vmatmul.mubr.f32.vlgmr.msra.gmra.mrb[24].mxu0 %v3521_v13 }
 0x49f   :  { %3463 = vmatpush1.bf16.msra.mxu0 %v3462_v63  ;;  %3059 = vmatprep.mubr.msk.f32.mxu0 %vm2016_vm12, %v3524_v48  ;;  %v3749_v63 = vld [vmem:[%s4995_s7 + $0x48] sm:$0xff]  }
 0x4a0   :  { %3464 = vmatprep.subr.bf16.mxu0 %v3789_v58 }
 0x4a2   :  { %2093 = vmatmul.mubr.f32.gmra.mrb[26].mxu0 %v3523_v12 }
 0x4a3   :  { %3466 = vmatpush1.bf16.msra.mxu0 %v3465_v11  ;;  %3080 = vmatprep.mubr.msk.f32.mxu0 %vm2016_vm12, %v3522_v39  ;;  %v3747_v39 = vld [vmem:[%s4995_s7 + $0x38] sm:$0xff]   ;;  %v3754_v11 = vld [vmem:[%s4995_s7 + $0x70] sm:$0xff]  }
 0x4a4   :  { %3467 = vmatprep.subr.bf16.mxu0 %v3789_v58 }
 0x4a7   :  { %3469 = vmatpush1.bf16.msra.mxu0 %v3468_v16  ;;  %v3757_v16 = vld [vmem:[%s4995_s7 + $0x88] sm:$0xff]  }
 0x4a8   :  { %3470 = vmatprep.subr.bf16.mxu0 %v3789_v58 }
 0x4ab   :  { %3472 = vmatpush1.bf16.msra.mxu0 %v3471_v3 }
 0x4ac   :  { %3473 = vmatprep.subr.bf16.mxu0 %v3789_v58 }
 0x4af   :  { %3475 = vmatpush1.bf16.msra.mxu0 %v3474_v22  ;;  %v2743_v22 = vsel %vm488_vm7, %v3763_v21, 0 }
 0x4b0   :  { %3476 = vmatprep.subr.bf16.mxu0 %v3789_v58  ;;  %3318 = vmatpush3.bf16.msra.mxu1 %v2743_v22 }
 0x4b3   :  { %3478 = vmatpush1.bf16.msra.mxu0 %v3477_v27 }
 0x4b4   :  { %3479 = vmatprep.subr.bf16.mxu0 %v3789_v58 }
 0x4b7   :  { %3481 = vmatpush1.bf16.msra.mxu0 %v3480_v0 }
 0x4b8   :  { %3482 = vmatprep.subr.bf16.mxu0 %v3789_v58 }
 0x4bb   :  { %3484 = vmatpush1.bf16.msra.mxu0 %v3483_v30 }
 0x4bc   :  { %3485 = vmatprep.subr.bf16.mxu0 %v3789_v58 }
 0x4bf   :  { %3487 = vmatpush1.bf16.msra.mxu0 %v3486_v33 }
 0x4c0   :  { %3488 = vmatprep.subr.bf16.mxu0 %v3789_v58 }
 0x4c3   :  { %3490 = vmatpush1.bf16.msra.mxu0 %v3489_v54 }
 0x4c4   :  { %3491 = vmatprep.subr.bf16.mxu0 %v3789_v58 }
 0x4c6   :  { %2184 = vmatmul.mubr.f32.vlgmr.msra.gmra.mrb[28].mxu0 %v3521_v13  ;;  %v3750_v13 = vld [vmem:[%s4995_s7 + $0x50] sm:$0xff]  }
 0x4c7   :  { %3081 = vmatprep.mubr.msk.f32.mxu0 %vm2016_vm12, %v3524_v48  ;;  %v3753_v48 = vld [vmem:[%s4995_s7 + $0x68] sm:$0xff]  }
 0x4ca   :  { %2189 = vmatmul.mubr.f32.gmra.mrb[30].mxu0 %v3523_v12  ;;  %v3755_v12 = vld [vmem:[%s4995_s7 + $0x78] sm:$0xff]  }
 0x4cb   :  { %3245 = vmatprep.mubr.msk.f32.mxu0 %vm3790_vm9, %v3791_v7 }
 0x571   :  { %v2089_v56 = vpop.f32.mrb[24].mxu0 }
 0x572   :  { %v2091_v17 = vpop.f32.mrb[25].mxu0 }
 0x575   :  { %v2094_v19 = vpop.f32.mrb[26].mxu0 }
 0x576   :  { %v2096_v23 = vpop.f32.mrb[27].mxu0 }
 0x599   :  { %v2185_v26 = vpop.f32.mrb[28].mxu0 }
 0x59a   :  { %v2194_v57 = vmax.f32 %v2089_v56, %v2185_v26  ;;  %v2187_v50 = vpop.f32.mrb[29].mxu0 }
 0x59d   :  { %v2190_v2 = vpop.f32.mrb[30].mxu0 }
 0x59e   :  { %v2195_v6 = vmax.f32 %v2094_v19, %v2190_v2  ;;  %v2192_v1 = vpop.f32.mrb[31].mxu0 }
 0x5a0   :  { %v3492_v61 = vpack.c.bf16 %v2195_v6, %v2194_v57 }
 0x5a2   :  { %3493 = vmatpush3.bf16.msra.mxu0 %v3492_v61 }
 0x5a3   :  { %3494 = vmatprep.subr.bf16.mxu0 %v3789_v58  ;;  %v3741_v58 = vld [vmem:[%s4995_s7 + $0x8] sm:$0xff]  }
 0x5a5   :  { %3246 = vmatmul.mubr.msk.f32.vlgmr.msra.gmra.mrb[32].mxu0 %vm2197_vm13, %v2196_v35 }
 0x5a6   :  { %3496 = vmatpush3.bf16.msra.mxu0 %v3492_v61  ;;  %3252 = vmatprep.mubr.msk.f32.mxu0 %vm3790_vm9, %v3791_v7 }
 0x5a7   :  { %3255 = vmatprep.subr.bf16.mxu0 %v3791_v7 }
 0x5a9   :  { %3253 = vmatmul.mubr.msk.f32.vlgmr.msra.gmra.mrb[34].mxu0 %vm2197_vm13, %v3083_v37 }
 0x5aa   :  { %3256 = vmatpush3.bf16.msra.mxu0 %v3740_v38  ;;  %3265 = vmatprep.mubr.msk.bf16.mxu0 %vm3790_vm9, %v3791_v7 }
 0x5ab   :  { %3257 = vmatprep.subr.bf16.mxu0 %v3791_v7 }
 0x5ae   :  { %3258 = vmatpush3.bf16.msra.mxu0 %v3741_v58 }
 0x5af   :  { %3259 = vmatprep.subr.bf16.mxu0 %v3791_v7 }
 0x5b2   :  { %3260 = vmatpush3.bf16.msra.mxu0 %v3742_v41 }
 0x5b3   :  { %3261 = vmatprep.subr.bf16.mxu0 %v3791_v7 }
 0x5b6   :  { %3262 = vmatpush3.bf16.msra.mxu0 %v3743_v42 }
 0x5b7   :  { %3263 = vmatprep.subr.bf16.mxu0 %v3791_v7 }
 0x5ba   :  { %3264 = vmatpush3.bf16.msra.mxu0 %v3744_v43 }
 0x5bb   :  { %3269 = vmatprep.subr.bf16.mxu0 %v3791_v7 }
 0x678   :  { %v2267_v49 = vpop.f32.mrb[32].mxu0 }
 0x679   :  { %v3247_v52 = vpop.f32.mrb[33].mxu0 }
 0x67c   :  { %v2342_v36 = vpop.f32.mrb[34].mxu0 }
 0x67d   :  { %v2346_v51 = vmax.f32 %v2267_v49, %v2342_v36  ;;  %v3254_v4 = vpop.f32.mrb[35].mxu0 }
 0x67f   :  { %v2347_v55 = vmax.f32 %v2346_v51, 0.0 }
 0x681   :  { %v2356_v62 = vpack.c.bf16 %v2347_v55, %v2347_v55 }
 0x683   :  { %3266 = vmatmul.mubr.msk.bf16.vlgmr.msra.gmra.mrb[36].mxu0 %vm2397_vm14, %v2356_v62  ;;  %v2454_v10 = vrot.slane %v2356_v62, 1  ;;  %v2540_v14 = vrot.slane %v2356_v62, 2  ;;  %v2626_v3 = vrot.slane %v2356_v62, 3 }
 0x684   :  { %3270 = vmatpush3.bf16.msra.mxu0 %v3745_v60  ;;  %3279 = vmatprep.mubr.msk.bf16.mxu0 %vm3790_vm9, %v3791_v7 }
 0x685   :  { %3271 = vmatprep.subr.bf16.mxu0 %v3791_v7 }
 0x688   :  { %3272 = vmatpush3.bf16.msra.mxu0 %v3746_v8 }
 0x689   :  { %3273 = vmatprep.subr.bf16.mxu0 %v3791_v7 }
 0x68c   :  { %3274 = vmatpush3.bf16.msra.mxu0 %v3747_v39 }
 0x68d   :  { %3275 = vmatprep.subr.bf16.mxu0 %v3791_v7 }
 0x690   :  { %3276 = vmatpush3.bf16.msra.mxu0 %v3748_v59 }
 0x691   :  { %3277 = vmatprep.subr.bf16.mxu0 %v3791_v7 }
 0x694   :  { %3278 = vmatpush3.bf16.msra.mxu0 %v3749_v63 }
 0x695   :  { %3283 = vmatprep.subr.bf16.mxu0 %v3791_v7 }
 0x697   :  { %3280 = vmatmul.mubr.msk.bf16.vlgmr.msra.gmra.mrb[36].mxu0 %vm2397_vm14, %v2454_v10 }
 0x698   :  { %3284 = vmatpush3.bf16.msra.mxu0 %v3750_v13  ;;  %3293 = vmatprep.mubr.msk.bf16.mxu0 %vm3790_vm9, %v3791_v7 }
 0x699   :  { %3285 = vmatprep.subr.bf16.mxu0 %v3791_v7 }
 0x69c   :  { %3286 = vmatpush3.bf16.msra.mxu0 %v3751_v45 }
 0x69d   :  { %3287 = vmatprep.subr.bf16.mxu0 %v3791_v7 }
 0x6a0   :  { %3288 = vmatpush3.bf16.msra.mxu0 %v3752_v46 }
 0x6a1   :  { %3289 = vmatprep.subr.bf16.mxu0 %v3791_v7 }
 0x6a4   :  { %3290 = vmatpush3.bf16.msra.mxu0 %v3753_v48 }
 0x6a5   :  { %3291 = vmatprep.subr.bf16.mxu0 %v3791_v7 }
 0x6a8   :  { %3292 = vmatpush3.bf16.msra.mxu0 %v3754_v11 }
 0x6a9   :  { %3297 = vmatprep.subr.bf16.mxu0 %v3791_v7 }
 0x6ab   :  { %3294 = vmatmul.mubr.msk.bf16.vlgmr.msra.gmra.mrb[36].mxu0 %vm2397_vm14, %v2540_v14 }
 0x6ac   :  { %3298 = vmatpush3.bf16.msra.mxu0 %v3755_v12  ;;  %3307 = vmatprep.mubr.msk.bf16.mxu0 %vm3790_vm9, %v3791_v7 }
 0x6ad   :  { %3299 = vmatprep.subr.bf16.mxu0 %v3791_v7 }
 0x6b0   :  { %3300 = vmatpush3.bf16.msra.mxu0 %v3756_v15 }
 0x6b1   :  { %3301 = vmatprep.subr.bf16.mxu0 %v3791_v7 }
 0x6b4   :  { %3302 = vmatpush3.bf16.msra.mxu0 %v3757_v16 }
 0x6b5   :  { %3303 = vmatprep.subr.bf16.mxu0 %v3791_v7 }
 0x6b8   :  { %3304 = vmatpush3.bf16.msra.mxu0 %v3758_v18 }
 0x6b9   :  { %3305 = vmatprep.subr.bf16.mxu0 %v3791_v7  ;;  %v3140_v7 = vld [vmem:[%s5000_s12] ss:$0 sm:$0xff] }
 0x6bc   :  { %3306 = vmatpush3.bf16.msra.mxu0 %v3759_v20 }
 0x6bf   :  { %3308 = vmatmul.mubr.msk.bf16.vlgmr.msra.gmra.mrb[36].mxu0 %vm2397_vm14, %v2626_v3 }
 0x792   :  { %v2694_v25 = vpop.f32.mrb[36].mxu0 }
 0x793   :  { %v3525_v27 = vadd.f32 %v3085_v24, %v2694_v25  ;;  %v3309_v40 = vpop.f32.mrb[37].mxu0 }
 0x794   :  { %v2697_v5 = vpop.f32.mrb[38].mxu0 }
 0x795   :  { %v2701_v0 = vmax.f32 %v3525_v27, 0.0  ;;  %v3310_v28 = vpop.f32.mrb[39].mxu0 }
 0x797   :  { %v2702_v29 = vpack.c.bf16 %v2701_v0, %v2701_v0 }
 0x799   :  { %3320 = vmatmul.mubr.msk.bf16.vlgmr.msra.gmra.mrb[40].mxu1 %vm2738_vm15, %v2702_v29 }
 0x86c   :  { %v2779_v30 = vpop.f32.mrb[40].mxu1 }
 0x86d   :  { %v2780_v31 = vadd.f32 %v3140_v7, %v2779_v30  ;;  %v3321_v32 = vpop.f32.mrb[41].mxu1 }
 0x86e   :  { %v2782_v33 = vpop.f32.mrb[42].mxu1 }
 0x86f   :  { %v3322_v34 = vpop.f32.mrb[43].mxu1  ;;  %2786 = vst.msk [vmem:[#allocation2] sm:$0x3] %vm2785_vm0, %v2780_v31 }
 0x870   :  { %3775 = shalt.err (!%p3772_p4)
}
 0x871   :  { %s3776_s12 = scalar_lea.hbm %s5001_s13, 32 }
 0x872   :  { %p3777_p5 = scmp.ne.s32.totalorder %s5001_s13, %s3776_s12  ;;  %p3780_p6 = scmp.lt.u32.totalorder %s3776_s12, %s5001_s13 }
 0x874   :  { %p3782_p7 = pnand %p3780_p6, %p3777_p5 }
 0x876   :  { %3785 = shalt.err (!%p3782_p7)
}
 0x877   :  { %2796 = dma.vmem_to_hbm [thread:$0]  %s2794_s4, 32, %s5001_s13, [#allocation3]  }
 0x878   :  { %3786 = dma.done.wait [#allocation3], 32  }
 0x879   :  { %3787 = vsyncadd [#allocation3], 4294967264 }
 0x87a   :  { %2800 = vsyncpa [#allocation3], 1 }

</bundles_post_ra>
